<compile_context>
chip_gen: v7x
topology: tpu7x:2x2x1
jax: 0.10.0
libtpu: 0.0.40
codegen_flags: <defaults>
</compile_context>

<pallas_src>
import jax
import jax.numpy as jnp
from jax import lax
from jax.experimental import pallas as pl
from jax.experimental.pallas import tpu as pltpu

_LANE = 128
_SUB = 8


def _round_up(x, m):
    return ((x + m - 1) // m) * m


def _make_kernel(p, p_pad, strip_r8, strips_per_tile, tile_r8, rows8, ragged):
    del p_pad  # scratch shape carries it; kept in the signature for clarity

    def kernel(centers_ref, tgt_ref, out_ref, minx_ref, ysum_ref, ycnt_ref):
        # centers_ref: (N, P) f32 in SMEM                      bin centers (scalars)
        # tgt_ref    : (1, tile_r8, 8, 128)                    one M tile of the depth map
        # out_ref    : (1, 1, 128)                             per-batch chamfer (last M tile)
        # minx_ref   : (p_pad, 8, 128)                         per-bin running min over pixels
        # ysum_ref   : (8, 128)                                 masked sum of per-pixel min
        # ycnt_ref   : (8, 128)                                 valid-pixel count
        b = pl.program_id(0)
        mm = pl.program_id(1)
        num_m = pl.num_programs(1)

        @pl.when(mm == 0)
        def _init():
            minx_ref[...] = jnp.full(minx_ref.shape, jnp.inf, jnp.float32)
            ysum_ref[...] = jnp.zeros(ysum_ref.shape, jnp.float32)
            ycnt_ref[...] = jnp.zeros(ycnt_ref.shape, jnp.float32)

        thresh = jnp.float32(1e-3)
        neg_inf = jnp.float32(-jnp.inf)

        # Hoist the P SMEM scalar loads out of the strip loop (scalar slots, free vs VALU).
        cs = [centers_ref[b, i] for i in range(p)]

        for s in range(strips_per_tile):
            t = tgt_ref[0, s * strip_r8:(s + 1) * strip_r8, :, :]      # (strip_r8, 8, 128)
            valid0 = t >= thresh
            if ragged:
                # Mask garbage rows read past the end of the array on the last (ragged) tile.
                r8 = lax.broadcasted_iota(jnp.int32, t.shape, 0) + (mm * tile_r8 + s * strip_r8)
                valid0 = jnp.logical_and(valid0, r8 < rows8)
            # -inf sentinel: (-inf - c)^2 = +inf so masked pixels never win any min, and
            # (t_m >= 1e-3) recovers the original validity mask exactly (incl. NaN / +inf t).
            t_m = jnp.where(valid0, t, neg_inf)

            miny = None
            for i in range(p):
                diff = t_m - cs[i]
                d = diff * diff
                miny = d if miny is None else jnp.minimum(miny, d)
                part = jnp.min(d, axis=0)                       # (8,128): elementwise over vregs
                minx_ref[i] = jnp.minimum(minx_ref[i], part)    # aligned full-vreg RMW

            valid = t_m >= thresh                               # recompute; not live across loop
            ysum_ref[...] += jnp.sum(jnp.where(valid, miny, jnp.float32(0.0)), axis=0)
            ycnt_ref[...] += jnp.sum(valid.astype(jnp.float32), axis=0)

        @pl.when(mm == num_m - 1)
        def _finalize():
            cham_x = jnp.float32(0.0)
            for i in range(p):
                cham_x = cham_x + jnp.min(minx_ref[i])
            cham_x = cham_x / jnp.float32(p)
            # NaN if a batch has zero valid pixels (same as the reference).
            cham_y = jnp.sum(ysum_ref[...]) / jnp.sum(ycnt_ref[...])
            out_ref[...] = jnp.full(out_ref.shape, cham_x + cham_y, out_ref.dtype)

    return kernel


def bins_chamfer_loss(bins, target_depth_maps, *, max_tile_rows=512, strip_rows=128):
    """bins: (N, P+1) float bin edges; target_depth_maps: (N, C, H, W) float (NCHW)."""
    bins = jnp.asarray(bins, jnp.float32)
    n, pp1 = bins.shape
    p = pp1 - 1
    p_pad = _round_up(p, _SUB)

    centers = 0.5 * (bins[:, 1:] + bins[:, :-1])                       # (N, P) f32 -> SMEM

    tgt = jnp.asarray(target_depth_maps, jnp.float32).reshape(n, -1)   # (N, M)
    m = tgt.shape[1]
    m_pad = _round_up(m, _SUB * _LANE)
    if m_pad != m:
        # Only pad to the next 1024 multiple (zeros fail the >=1e-3 test); no pad at all for
        # typical depth maps (e.g. 480*640).  Ragged M tiles are masked in-kernel instead.
        tgt = jnp.pad(tgt, ((0, 0), (0, m_pad - m)))
    rows8 = m_pad // (_SUB * _LANE)
    tgt = tgt.reshape(n, rows8, _SUB, _LANE)                           # free row-major reshape

    strip_r8 = max(1, min(strip_rows // _SUB, rows8))                  # strip = strip_r8*8 rows
    strips_per_tile = max(1, min(max(1, max_tile_rows // (strip_r8 * _SUB)),
                                 rows8 // strip_r8))
    tile_r8 = strip_r8 * strips_per_tile                               # always <= rows8
    num_m = -(-rows8 // tile_r8)
    ragged = (rows8 % tile_r8) != 0

    kernel = _make_kernel(p, p_pad, strip_r8, strips_per_tile, tile_r8, rows8, ragged)

    per_batch = pl.pallas_call(
        kernel,
        out_shape=jax.ShapeDtypeStruct((n, 1, _LANE), jnp.float32),
        grid_spec=pltpu.PrefetchScalarGridSpec(
            num_scalar_prefetch=0,
            grid=(n, num_m),
            in_specs=[
                pl.BlockSpec(memory_space=pltpu.MemorySpace.SMEM),      # bin centers (scalars)
                pl.BlockSpec((1, tile_r8, _SUB, _LANE), lambda b, mm: (b, mm, 0, 0)),
            ],
            out_specs=pl.BlockSpec((1, 1, _LANE), lambda b, mm: (b, 0, 0)),
            scratch_shapes=[
                pltpu.VMEM((p_pad, _SUB, _LANE), jnp.float32),   # per-bin running min
                pltpu.VMEM((_SUB, _LANE), jnp.float32),          # masked min_y partial sum
                pltpu.VMEM((_SUB, _LANE), jnp.float32),          # valid-pixel count
            ],
        ),
        compiler_params=pltpu.CompilerParams(
            dimension_semantics=("parallel", "arbitrary")),
        cost_estimate=pl.CostEstimate(
            flops=3 * n * p * m_pad,
            transcendentals=0,
            bytes_accessed=4 * n * m_pad + 4 * n * p + 4 * n * _LANE),
    )(centers, tgt)

    # TODO(synk): v7x batch-1 — split the M axis into an outer "parallel" grid dim with
    # per-core partial minx/ysum/ycnt outputs combined in the wrapper to use both TensorCores.

    # batch_reduction="mean": mean over batch of (cham_x_b + cham_y_b)
    return jnp.mean(per_batch[:, 0, 0])


def _reference_loss(bins, target_depth_maps):
    # Pure-JAX reference (same math as pytorch3d chamfer_distance with defaults).
    bins = jnp.asarray(bins, jnp.float32)
    centers = 0.5 * (bins[:, 1:] + bins[:, :-1])                        # (N, P)
    t = jnp.asarray(target_depth_maps, jnp.float32).reshape(target_depth_maps.shape[0], -1)
    mask = t >= 0.001
    d = (centers[:, :, None] - t[:, None, :]) ** 2                      # (N, P, M)
    d_x = jnp.where(mask[:, None, :], d, jnp.inf)
    cham_x = jnp.mean(jnp.min(d_x, axis=2), axis=1)                     # (N,)
    min_y = jnp.min(d, axis=1)                                          # (N, M)
    cnt = jnp.sum(mask.astype(jnp.float32), axis=1)
    cham_y = jnp.sum(jnp.where(mask, min_y, 0.0), axis=1) / cnt
    return jnp.mean(cham_x + cham_y)


if __name__ == "__main__":
    key = jax.random.PRNGKey(0)
    k1, k2, k3, k4, k5 = jax.random.split(key, 5)

    N, P1 = 2, 17          # 17 bin edges -> 16 bin centers
    C = 1

    # Monotone positive bin edges (as a depth-bin head would produce).
    bin_widths = jax.random.uniform(k1, (N, P1), jnp.float32, minval=0.1, maxval=1.0)
    bins = jnp.cumsum(bin_widths, axis=1)

    # Case 1: small NCHW map whose flattened size (288) is not a multiple of 1024 (exercises
    # the wrapper pad and the >=1e-3 mask).
    H1, W1 = 16, 18
    depth1 = jax.random.uniform(k2, (N, C, H1, W1), jnp.float32, minval=0.0, maxval=10.0)
    depth1 = jnp.where(jax.random.uniform(k3, (N, C, H1, W1)) < 0.2, 0.0, depth1)

    # Case 2: taller map (M=2560).  Run with default tiles (multi-vreg strips) and with tiny
    # tiles (forces a multi-tile grid, multiple strips, and the ragged in-kernel row mask).
    H2, W2 = 40, 64
    depth2 = jax.random.uniform(k4, (N, C, H2, W2), jnp.float32, minval=0.0, maxval=10.0)
    depth2 = jnp.where(jax.random.uniform(k5, (N, C, H2, W2)) < 0.2, 0.0, depth2)

    checks = [
        (bins, depth1, {}),
        (bins, depth2, {}),
        (bins, depth2, dict(max_tile_rows=16, strip_rows=8)),
    ]
    for b_, d_, kw in checks:
        got = jax.block_until_ready(bins_chamfer_loss(b_, d_, **kw))
        ref = jax.block_until_ready(_reference_loss(b_, d_))
        if not bool(jnp.allclose(got, ref, rtol=1e-4, atol=1e-5)):
            raise AssertionError(f"mismatch (kw={kw}): kernel={got} ref={ref}")
    print("KERNEL_OK")
</pallas_src>

<mosaic_0001>
module attributes {stable_mosaic.version = 11 : i64} {
  func.func @kernel(%arg0: i32, %arg1: i32, %arg2: memref<2x16xf32, #tpu.memory_space<smem>>, %arg3: memref<1x1x8x128xf32, #tpu.memory_space<vmem>>, %arg4: memref<1x1x128xf32, #tpu.memory_space<vmem>>, %arg5: memref<16x8x128xf32, #tpu.memory_space<vmem>>, %arg6: memref<8x128xf32, #tpu.memory_space<vmem>>, %arg7: memref<8x128xf32, #tpu.memory_space<vmem>>) attributes {dimension_semantics = [#tpu.dimension_semantics<parallel>, #tpu.dimension_semantics<arbitrary>], iteration_bounds = array<i64: 2, 1>, scalar_prefetch = 0 : i64, scratch_operands = 3 : i64, tpu.core_type = #tpu.core_type<tc>, window_params = [{transform_indices = @transform_0, window_bounds = array<i64: 2, 16>}, {transform_indices = @transform_1, window_bounds = array<i64: 1, 1, 8, 128>}, {transform_indices = @transform_2, window_bounds = array<i64: 1, 1, 128>}]} {
    %c0_i32 = arith.constant 0 : i32
    %0 = arith.cmpi eq, %arg1, %c0_i32 : i32
    %1 = arith.extui %0 : i1 to i32
    %c0_i32_0 = arith.constant 0 : i32
    %2 = arith.cmpi ne, %1, %c0_i32_0 : i32
    scf.if %2 {
      %cst_132 = arith.constant 0x7F800000 : f32
      %233 = vector.broadcast %cst_132 : f32 to vector<16x8x128xf32>
      %c0_133 = arith.constant 0 : index
      %c0_134 = arith.constant 0 : index
      %c0_135 = arith.constant 0 : index
      %234 = vector.load %arg5[%c0_133, %c0_134, %c0_135] : memref<16x8x128xf32, #tpu.memory_space<vmem>>, vector<16x8x128xf32>
      tpu.vector_store %arg5[%c0_133, %c0_134, %c0_135], %233 {strides = array<i32>} : memref<16x8x128xf32, #tpu.memory_space<vmem>>, vector<16x8x128xf32>,
      %cst_136 = arith.constant 0.000000e+00 : f32
      %235 = vector.broadcast %cst_136 : f32 to vector<8x128xf32>
      %c0_137 = arith.constant 0 : index
      %c0_138 = arith.constant 0 : index
      %236 = vector.load %arg6[%c0_137, %c0_138] : memref<8x128xf32, #tpu.memory_space<vmem>>, vector<8x128xf32>
      tpu.vector_store %arg6[%c0_137, %c0_138], %235 {strides = array<i32>} : memref<8x128xf32, #tpu.memory_space<vmem>>, vector<8x128xf32>,
      %cst_139 = arith.constant 0.000000e+00 : f32
      %237 = vector.broadcast %cst_139 : f32 to vector<8x128xf32>
      %c0_140 = arith.constant 0 : index
      %c0_141 = arith.constant 0 : index
      %238 = vector.load %arg7[%c0_140, %c0_141] : memref<8x128xf32, #tpu.memory_space<vmem>>, vector<8x128xf32>
      tpu.vector_store %arg7[%c0_140, %c0_141], %237 {strides = array<i32>} : memref<8x128xf32, #tpu.memory_space<vmem>>, vector<8x128xf32>,
    } else {
    }
    %3 = arith.index_cast %arg0 : i32 to index
    %c0 = arith.constant 0 : index
    %4 = memref.load %arg2[%3, %c0] : memref<2x16xf32, #tpu.memory_space<smem>>
    %5 = arith.index_cast %arg0 : i32 to index
    %c1 = arith.constant 1 : index
    %6 = memref.load %arg2[%5, %c1] : memref<2x16xf32, #tpu.memory_space<smem>>
    %7 = arith.index_cast %arg0 : i32 to index
    %c2 = arith.constant 2 : index
    %8 = memref.load %arg2[%7, %c2] : memref<2x16xf32, #tpu.memory_space<smem>>
    %9 = arith.index_cast %arg0 : i32 to index
    %c3 = arith.constant 3 : index
    %10 = memref.load %arg2[%9, %c3] : memref<2x16xf32, #tpu.memory_space<smem>>
    %11 = arith.index_cast %arg0 : i32 to index
    %c4 = arith.constant 4 : index
    %12 = memref.load %arg2[%11, %c4] : memref<2x16xf32, #tpu.memory_space<smem>>
    %13 = arith.index_cast %arg0 : i32 to index
    %c5 = arith.constant 5 : index
    %14 = memref.load %arg2[%13, %c5] : memref<2x16xf32, #tpu.memory_space<smem>>
    %15 = arith.index_cast %arg0 : i32 to index
    %c6 = arith.constant 6 : index
    %16 = memref.load %arg2[%15, %c6] : memref<2x16xf32, #tpu.memory_space<smem>>
    %17 = arith.index_cast %arg0 : i32 to index
    %c7 = arith.constant 7 : index
    %18 = memref.load %arg2[%17, %c7] : memref<2x16xf32, #tpu.memory_space<smem>>
    %19 = arith.index_cast %arg0 : i32 to index
    %c8 = arith.constant 8 : index
    %20 = memref.load %arg2[%19, %c8] : memref<2x16xf32, #tpu.memory_space<smem>>
    %21 = arith.index_cast %arg0 : i32 to index
    %c9 = arith.constant 9 : index
    %22 = memref.load %arg2[%21, %c9] : memref<2x16xf32, #tpu.memory_space<smem>>
    %23 = arith.index_cast %arg0 : i32 to index
    %c10 = arith.constant 10 : index
    %24 = memref.load %arg2[%23, %c10] : memref<2x16xf32, #tpu.memory_space<smem>>
    %25 = arith.index_cast %arg0 : i32 to index
    %c11 = arith.constant 11 : index
    %26 = memref.load %arg2[%25, %c11] : memref<2x16xf32, #tpu.memory_space<smem>>
    %27 = arith.index_cast %arg0 : i32 to index
    %c12 = arith.constant 12 : index
    %28 = memref.load %arg2[%27, %c12] : memref<2x16xf32, #tpu.memory_space<smem>>
    %29 = arith.index_cast %arg0 : i32 to index
    %c13 = arith.constant 13 : index
    %30 = memref.load %arg2[%29, %c13] : memref<2x16xf32, #tpu.memory_space<smem>>
    %31 = arith.index_cast %arg0 : i32 to index
    %c14 = arith.constant 14 : index
    %32 = memref.load %arg2[%31, %c14] : memref<2x16xf32, #tpu.memory_space<smem>>
    %33 = arith.index_cast %arg0 : i32 to index
    %c15 = arith.constant 15 : index
    %34 = memref.load %arg2[%33, %c15] : memref<2x16xf32, #tpu.memory_space<smem>>
    %c0_1 = arith.constant 0 : index
    %c0_2 = arith.constant 0 : index
    %c0_3 = arith.constant 0 : index
    %c0_4 = arith.constant 0 : index
    %35 = vector.load %arg3[%c0_1, %c0_2, %c0_3, %c0_4] : memref<1x1x8x128xf32, #tpu.memory_space<vmem>>, vector<1x1x8x128xf32>
    %36 = vector.shape_cast %35 : vector<1x1x8x128xf32> to vector<1x8x128xf32>
    %cst = arith.constant 1.000000e-03 : f32
    %37 = vector.broadcast %cst : f32 to vector<1x8x128xf32>
    %38 = arith.cmpf oge, %36, %37 : vector<1x8x128xf32>
    %cst_5 = arith.constant 0xFF800000 : f32
    %39 = vector.broadcast %cst_5 : f32 to vector<1x8x128xf32>
    %40 = arith.select %38, %36, %39 : vector<1x8x128xi1>, vector<1x8x128xf32>
    %41 = vector.broadcast %4 : f32 to vector<1x8x128xf32>
    %42 = arith.subf %40, %41 : vector<1x8x128xf32>
    %43 = arith.mulf %42, %42 : vector<1x8x128xf32>
    %cst_6 = arith.constant dense<0x7F800000> : vector<8x128xf32>
    %44 = vector.multi_reduction <minimumf>, %43, %cst_6 [0] : vector<1x8x128xf32> to vector<8x128xf32>
    %c0_7 = arith.constant 0 : index
    %c0_8 = arith.constant 0 : index
    %c0_9 = arith.constant 0 : index
    %45 = vector.load %arg5[%c0_7, %c0_8, %c0_9] : memref<16x8x128xf32, #tpu.memory_space<vmem>>, vector<1x8x128xf32>
    %46 = vector.shape_cast %45 : vector<1x8x128xf32> to vector<8x128xf32>
    %47 = arith.minimumf %46, %44 : vector<8x128xf32>
    %c0_10 = arith.constant 0 : index
    %c0_11 = arith.constant 0 : index
    %c0_12 = arith.constant 0 : index
    %48 = vector.load %arg5[%c0_10, %c0_11, %c0_12] : memref<16x8x128xf32, #tpu.memory_space<vmem>>, vector<1x8x128xf32>
    %49 = vector.shape_cast %48 : vector<1x8x128xf32> to vector<8x128xf32>
    %50 = vector.shape_cast %47 : vector<8x128xf32> to vector<1x8x128xf32>
    tpu.vector_store %arg5[%c0_10, %c0_11, %c0_12], %50 {strides = array<i32>} : memref<16x8x128xf32, #tpu.memory_space<vmem>>, vector<1x8x128xf32>,
    %51 = vector.broadcast %6 : f32 to vector<1x8x128xf32>
    %52 = arith.subf %40, %51 : vector<1x8x128xf32>
    %53 = arith.mulf %52, %52 : vector<1x8x128xf32>
    %54 = arith.minimumf %43, %53 : vector<1x8x128xf32>
    %cst_13 = arith.constant dense<0x7F800000> : vector<8x128xf32>
    %55 = vector.multi_reduction <minimumf>, %53, %cst_13 [0] : vector<1x8x128xf32> to vector<8x128xf32>
    %c1_14 = arith.constant 1 : index
    %c0_15 = arith.constant 0 : index
    %c0_16 = arith.constant 0 : index
    %56 = vector.load %arg5[%c1_14, %c0_15, %c0_16] : memref<16x8x128xf32, #tpu.memory_space<vmem>>, vector<1x8x128xf32>
    %57 = vector.shape_cast %56 : vector<1x8x128xf32> to vector<8x128xf32>
    %58 = arith.minimumf %57, %55 : vector<8x128xf32>
    %c1_17 = arith.constant 1 : index
    %c0_18 = arith.constant 0 : index
    %c0_19 = arith.constant 0 : index
    %59 = vector.load %arg5[%c1_17, %c0_18, %c0_19] : memref<16x8x128xf32, #tpu.memory_space<vmem>>, vector<1x8x128xf32>
    %60 = vector.shape_cast %59 : vector<1x8x128xf32> to vector<8x128xf32>
    %61 = vector.shape_cast %58 : vector<8x128xf32> to vector<1x8x128xf32>
    tpu.vector_store %arg5[%c1_17, %c0_18, %c0_19], %61 {strides = array<i32>} : memref<16x8x128xf32, #tpu.memory_space<vmem>>, vector<1x8x128xf32>,
    %62 = vector.broadcast %8 : f32 to vector<1x8x128xf32>
    %63 = arith.subf %40, %62 : vector<1x8x128xf32>
    %64 = arith.mulf %63, %63 : vector<1x8x128xf32>
    %65 = arith.minimumf %54, %64 : vector<1x8x128xf32>
    %cst_20 = arith.constant dense<0x7F800000> : vector<8x128xf32>
    %66 = vector.multi_reduction <minimumf>, %64, %cst_20 [0] : vector<1x8x128xf32> to vector<8x128xf32>
    %c2_21 = arith.constant 2 : index
    %c0_22 = arith.constant 0 : index
    %c0_23 = arith.constant 0 : index
    %67 = vector.load %arg5[%c2_21, %c0_22, %c0_23] : memref<16x8x128xf32, #tpu.memory_space<vmem>>, vector<1x8x128xf32>
    %68 = vector.shape_cast %67 : vector<1x8x128xf32> to vector<8x128xf32>
    %69 = arith.minimumf %68, %66 : vector<8x128xf32>
    %c2_24 = arith.constant 2 : index
    %c0_25 = arith.constant 0 : index
    %c0_26 = arith.constant 0 : index
    %70 = vector.load %arg5[%c2_24, %c0_25, %c0_26] : memref<16x8x128xf32, #tpu.memory_space<vmem>>, vector<1x8x128xf32>
    %71 = vector.shape_cast %70 : vector<1x8x128xf32> to vector<8x128xf32>
    %72 = vector.shape_cast %69 : vector<8x128xf32> to vector<1x8x128xf32>
    tpu.vector_store %arg5[%c2_24, %c0_25, %c0_26], %72 {strides = array<i32>} : memref<16x8x128xf32, #tpu.memory_space<vmem>>, vector<1x8x128xf32>,
    %73 = vector.broadcast %10 : f32 to vector<1x8x128xf32>
    %74 = arith.subf %40, %73 : vector<1x8x128xf32>
    %75 = arith.mulf %74, %74 : vector<1x8x128xf32>
    %76 = arith.minimumf %65, %75 : vector<1x8x128xf32>
    %cst_27 = arith.constant dense<0x7F800000> : vector<8x128xf32>
    %77 = vector.multi_reduction <minimumf>, %75, %cst_27 [0] : vector<1x8x128xf32> to vector<8x128xf32>
    %c3_28 = arith.constant 3 : index
    %c0_29 = arith.constant 0 : index
    %c0_30 = arith.constant 0 : index
    %78 = vector.load %arg5[%c3_28, %c0_29, %c0_30] : memref<16x8x128xf32, #tpu.memory_space<vmem>>, vector<1x8x128xf32>
    %79 = vector.shape_cast %78 : vector<1x8x128xf32> to vector<8x128xf32>
    %80 = arith.minimumf %79, %77 : vector<8x128xf32>
    %c3_31 = arith.constant 3 : index
    %c0_32 = arith.constant 0 : index
    %c0_33 = arith.constant 0 : index
    %81 = vector.load %arg5[%c3_31, %c0_32, %c0_33] : memref<16x8x128xf32, #tpu.memory_space<vmem>>, vector<1x8x128xf32>
    %82 = vector.shape_cast %81 : vector<1x8x128xf32> to vector<8x128xf32>
    %83 = vector.shape_cast %80 : vector<8x128xf32> to vector<1x8x128xf32>
    tpu.vector_store %arg5[%c3_31, %c0_32, %c0_33], %83 {strides = array<i32>} : memref<16x8x128xf32, #tpu.memory_space<vmem>>, vector<1x8x128xf32>,
    %84 = vector.broadcast %12 : f32 to vector<1x8x128xf32>
    %85 = arith.subf %40, %84 : vector<1x8x128xf32>
    %86 = arith.mulf %85, %85 : vector<1x8x128xf32>
    %87 = arith.minimumf %76, %86 : vector<1x8x128xf32>
    %cst_34 = arith.constant dense<0x7F800000> : vector<8x128xf32>
    %88 = vector.multi_reduction <minimumf>, %86, %cst_34 [0] : vector<1x8x128xf32> to vector<8x128xf32>
    %c4_35 = arith.constant 4 : index
    %c0_36 = arith.constant 0 : index
    %c0_37 = arith.constant 0 : index
    %89 = vector.load %arg5[%c4_35, %c0_36, %c0_37] : memref<16x8x128xf32, #tpu.memory_space<vmem>>, vector<1x8x128xf32>
    %90 = vector.shape_cast %89 : vector<1x8x128xf32> to vector<8x128xf32>
    %91 = arith.minimumf %90, %88 : vector<8x128xf32>
    %c4_38 = arith.constant 4 : index
    %c0_39 = arith.constant 0 : index
    %c0_40 = arith.constant 0 : index
    %92 = vector.load %arg5[%c4_38, %c0_39, %c0_40] : memref<16x8x128xf32, #tpu.memory_space<vmem>>, vector<1x8x128xf32>
    %93 = vector.shape_cast %92 : vector<1x8x128xf32> to vector<8x128xf32>
    %94 = vector.shape_cast %91 : vector<8x128xf32> to vector<1x8x128xf32>
    tpu.vector_store %arg5[%c4_38, %c0_39, %c0_40], %94 {strides = array<i32>} : memref<16x8x128xf32, #tpu.memory_space<vmem>>, vector<1x8x128xf32>,
    %95 = vector.broadcast %14 : f32 to vector<1x8x128xf32>
    %96 = arith.subf %40, %95 : vector<1x8x128xf32>
    %97 = arith.mulf %96, %96 : vector<1x8x128xf32>
    %98 = arith.minimumf %87, %97 : vector<1x8x128xf32>
    %cst_41 = arith.constant dense<0x7F800000> : vector<8x128xf32>
    %99 = vector.multi_reduction <minimumf>, %97, %cst_41 [0] : vector<1x8x128xf32> to vector<8x128xf32>
    %c5_42 = arith.constant 5 : index
    %c0_43 = arith.constant 0 : index
    %c0_44 = arith.constant 0 : index
    %100 = vector.load %arg5[%c5_42, %c0_43, %c0_44] : memref<16x8x128xf32, #tpu.memory_space<vmem>>, vector<1x8x128xf32>
    %101 = vector.shape_cast %100 : vector<1x8x128xf32> to vector<8x128xf32>
    %102 = arith.minimumf %101, %99 : vector<8x128xf32>
    %c5_45 = arith.constant 5 : index
    %c0_46 = arith.constant 0 : index
    %c0_47 = arith.constant 0 : index
    %103 = vector.load %arg5[%c5_45, %c0_46, %c0_47] : memref<16x8x128xf32, #tpu.memory_space<vmem>>, vector<1x8x128xf32>
    %104 = vector.shape_cast %103 : vector<1x8x128xf32> to vector<8x128xf32>
    %105 = vector.shape_cast %102 : vector<8x128xf32> to vector<1x8x128xf32>
    tpu.vector_store %arg5[%c5_45, %c0_46, %c0_47], %105 {strides = array<i32>} : memref<16x8x128xf32, #tpu.memory_space<vmem>>, vector<1x8x128xf32>,
    %106 = vector.broadcast %16 : f32 to vector<1x8x128xf32>
    %107 = arith.subf %40, %106 : vector<1x8x128xf32>
    %108 = arith.mulf %107, %107 : vector<1x8x128xf32>
    %109 = arith.minimumf %98, %108 : vector<1x8x128xf32>
    %cst_48 = arith.constant dense<0x7F800000> : vector<8x128xf32>
    %110 = vector.multi_reduction <minimumf>, %108, %cst_48 [0] : vector<1x8x128xf32> to vector<8x128xf32>
    %c6_49 = arith.constant 6 : index
    %c0_50 = arith.constant 0 : index
    %c0_51 = arith.constant 0 : index
    %111 = vector.load %arg5[%c6_49, %c0_50, %c0_51] : memref<16x8x128xf32, #tpu.memory_space<vmem>>, vector<1x8x128xf32>
    %112 = vector.shape_cast %111 : vector<1x8x128xf32> to vector<8x128xf32>
    %113 = arith.minimumf %112, %110 : vector<8x128xf32>
    %c6_52 = arith.constant 6 : index
    %c0_53 = arith.constant 0 : index
    %c0_54 = arith.constant 0 : index
    %114 = vector.load %arg5[%c6_52, %c0_53, %c0_54] : memref<16x8x128xf32, #tpu.memory_space<vmem>>, vector<1x8x128xf32>
    %115 = vector.shape_cast %114 : vector<1x8x128xf32> to vector<8x128xf32>
    %116 = vector.shape_cast %113 : vector<8x128xf32> to vector<1x8x128xf32>
    tpu.vector_store %arg5[%c6_52, %c0_53, %c0_54], %116 {strides = array<i32>} : memref<16x8x128xf32, #tpu.memory_space<vmem>>, vector<1x8x128xf32>,
    %117 = vector.broadcast %18 : f32 to vector<1x8x128xf32>
    %118 = arith.subf %40, %117 : vector<1x8x128xf32>
    %119 = arith.mulf %118, %118 : vector<1x8x128xf32>
    %120 = arith.minimumf %109, %119 : vector<1x8x128xf32>
    %cst_55 = arith.constant dense<0x7F800000> : vector<8x128xf32>
    %121 = vector.multi_reduction <minimumf>, %119, %cst_55 [0] : vector<1x8x128xf32> to vector<8x128xf32>
    %c7_56 = arith.constant 7 : index
    %c0_57 = arith.constant 0 : index
    %c0_58 = arith.constant 0 : index
    %122 = vector.load %arg5[%c7_56, %c0_57, %c0_58] : memref<16x8x128xf32, #tpu.memory_space<vmem>>, vector<1x8x128xf32>
    %123 = vector.shape_cast %122 : vector<1x8x128xf32> to vector<8x128xf32>
    %124 = arith.minimumf %123, %121 : vector<8x128xf32>
    %c7_59 = arith.constant 7 : index
    %c0_60 = arith.constant 0 : index
    %c0_61 = arith.constant 0 : index
    %125 = vector.load %arg5[%c7_59, %c0_60, %c0_61] : memref<16x8x128xf32, #tpu.memory_space<vmem>>, vector<1x8x128xf32>
    %126 = vector.shape_cast %125 : vector<1x8x128xf32> to vector<8x128xf32>
    %127 = vector.shape_cast %124 : vector<8x128xf32> to vector<1x8x128xf32>
    tpu.vector_store %arg5[%c7_59, %c0_60, %c0_61], %127 {strides = array<i32>} : memref<16x8x128xf32, #tpu.memory_space<vmem>>, vector<1x8x128xf32>,
    %128 = vector.broadcast %20 : f32 to vector<1x8x128xf32>
    %129 = arith.subf %40, %128 : vector<1x8x128xf32>
    %130 = arith.mulf %129, %129 : vector<1x8x128xf32>
    %131 = arith.minimumf %120, %130 : vector<1x8x128xf32>
    %cst_62 = arith.constant dense<0x7F800000> : vector<8x128xf32>
    %132 = vector.multi_reduction <minimumf>, %130, %cst_62 [0] : vector<1x8x128xf32> to vector<8x128xf32>
    %c8_63 = arith.constant 8 : index
    %c0_64 = arith.constant 0 : index
    %c0_65 = arith.constant 0 : index
    %133 = vector.load %arg5[%c8_63, %c0_64, %c0_65] : memref<16x8x128xf32, #tpu.memory_space<vmem>>, vector<1x8x128xf32>
    %134 = vector.shape_cast %133 : vector<1x8x128xf32> to vector<8x128xf32>
    %135 = arith.minimumf %134, %132 : vector<8x128xf32>
    %c8_66 = arith.constant 8 : index
    %c0_67 = arith.constant 0 : index
    %c0_68 = arith.constant 0 : index
    %136 = vector.load %arg5[%c8_66, %c0_67, %c0_68] : memref<16x8x128xf32, #tpu.memory_space<vmem>>, vector<1x8x128xf32>
    %137 = vector.shape_cast %136 : vector<1x8x128xf32> to vector<8x128xf32>
    %138 = vector.shape_cast %135 : vector<8x128xf32> to vector<1x8x128xf32>
    tpu.vector_store %arg5[%c8_66, %c0_67, %c0_68], %138 {strides = array<i32>} : memref<16x8x128xf32, #tpu.memory_space<vmem>>, vector<1x8x128xf32>,
    %139 = vector.broadcast %22 : f32 to vector<1x8x128xf32>
    %140 = arith.subf %40, %139 : vector<1x8x128xf32>
    %141 = arith.mulf %140, %140 : vector<1x8x128xf32>
    %142 = arith.minimumf %131, %141 : vector<1x8x128xf32>
    %cst_69 = arith.constant dense<0x7F800000> : vector<8x128xf32>
    %143 = vector.multi_reduction <minimumf>, %141, %cst_69 [0] : vector<1x8x128xf32> to vector<8x128xf32>
    %c9_70 = arith.constant 9 : index
    %c0_71 = arith.constant 0 : index
    %c0_72 = arith.constant 0 : index
    %144 = vector.load %arg5[%c9_70, %c0_71, %c0_72] : memref<16x8x128xf32, #tpu.memory_space<vmem>>, vector<1x8x128xf32>
    %145 = vector.shape_cast %144 : vector<1x8x128xf32> to vector<8x128xf32>
    %146 = arith.minimumf %145, %143 : vector<8x128xf32>
    %c9_73 = arith.constant 9 : index
    %c0_74 = arith.constant 0 : index
    %c0_75 = arith.constant 0 : index
    %147 = vector.load %arg5[%c9_73, %c0_74, %c0_75] : memref<16x8x128xf32, #tpu.memory_space<vmem>>, vector<1x8x128xf32>
    %148 = vector.shape_cast %147 : vector<1x8x128xf32> to vector<8x128xf32>
    %149 = vector.shape_cast %146 : vector<8x128xf32> to vector<1x8x128xf32>
    tpu.vector_store %arg5[%c9_73, %c0_74, %c0_75], %149 {strides = array<i32>} : memref<16x8x128xf32, #tpu.memory_space<vmem>>, vector<1x8x128xf32>,
    %150 = vector.broadcast %24 : f32 to vector<1x8x128xf32>
    %151 = arith.subf %40, %150 : vector<1x8x128xf32>
    %152 = arith.mulf %151, %151 : vector<1x8x128xf32>
    %153 = arith.minimumf %142, %152 : vector<1x8x128xf32>
    %cst_76 = arith.constant dense<0x7F800000> : vector<8x128xf32>
    %154 = vector.multi_reduction <minimumf>, %152, %cst_76 [0] : vector<1x8x128xf32> to vector<8x128xf32>
    %c10_77 = arith.constant 10 : index
    %c0_78 = arith.constant 0 : index
    %c0_79 = arith.constant 0 : index
    %155 = vector.load %arg5[%c10_77, %c0_78, %c0_79] : memref<16x8x128xf32, #tpu.memory_space<vmem>>, vector<1x8x128xf32>
    %156 = vector.shape_cast %155 : vector<1x8x128xf32> to vector<8x128xf32>
    %157 = arith.minimumf %156, %154 : vector<8x128xf32>
    %c10_80 = arith.constant 10 : index
    %c0_81 = arith.constant 0 : index
    %c0_82 = arith.constant 0 : index
    %158 = vector.load %arg5[%c10_80, %c0_81, %c0_82] : memref<16x8x128xf32, #tpu.memory_space<vmem>>, vector<1x8x128xf32>
    %159 = vector.shape_cast %158 : vector<1x8x128xf32> to vector<8x128xf32>
    %160 = vector.shape_cast %157 : vector<8x128xf32> to vector<1x8x128xf32>
    tpu.vector_store %arg5[%c10_80, %c0_81, %c0_82], %160 {strides = array<i32>} : memref<16x8x128xf32, #tpu.memory_space<vmem>>, vector<1x8x128xf32>,
    %161 = vector.broadcast %26 : f32 to vector<1x8x128xf32>
    %162 = arith.subf %40, %161 : vector<1x8x128xf32>
    %163 = arith.mulf %162, %162 : vector<1x8x128xf32>
    %164 = arith.minimumf %153, %163 : vector<1x8x128xf32>
    %cst_83 = arith.constant dense<0x7F800000> : vector<8x128xf32>
    %165 = vector.multi_reduction <minimumf>, %163, %cst_83 [0] : vector<1x8x128xf32> to vector<8x128xf32>
    %c11_84 = arith.constant 11 : index
    %c0_85 = arith.constant 0 : index
    %c0_86 = arith.constant 0 : index
    %166 = vector.load %arg5[%c11_84, %c0_85, %c0_86] : memref<16x8x128xf32, #tpu.memory_space<vmem>>, vector<1x8x128xf32>
    %167 = vector.shape_cast %166 : vector<1x8x128xf32> to vector<8x128xf32>
    %168 = arith.minimumf %167, %165 : vector<8x128xf32>
    %c11_87 = arith.constant 11 : index
    %c0_88 = arith.constant 0 : index
    %c0_89 = arith.constant 0 : index
    %169 = vector.load %arg5[%c11_87, %c0_88, %c0_89] : memref<16x8x128xf32, #tpu.memory_space<vmem>>, vector<1x8x128xf32>
    %170 = vector.shape_cast %169 : vector<1x8x128xf32> to vector<8x128xf32>
    %171 = vector.shape_cast %168 : vector<8x128xf32> to vector<1x8x128xf32>
    tpu.vector_store %arg5[%c11_87, %c0_88, %c0_89], %171 {strides = array<i32>} : memref<16x8x128xf32, #tpu.memory_space<vmem>>, vector<1x8x128xf32>,
    %172 = vector.broadcast %28 : f32 to vector<1x8x128xf32>
    %173 = arith.subf %40, %172 : vector<1x8x128xf32>
    %174 = arith.mulf %173, %173 : vector<1x8x128xf32>
    %175 = arith.minimumf %164, %174 : vector<1x8x128xf32>
    %cst_90 = arith.constant dense<0x7F800000> : vector<8x128xf32>
    %176 = vector.multi_reduction <minimumf>, %174, %cst_90 [0] : vector<1x8x128xf32> to vector<8x128xf32>
    %c12_91 = arith.constant 12 : index
    %c0_92 = arith.constant 0 : index
    %c0_93 = arith.constant 0 : index
    %177 = vector.load %arg5[%c12_91, %c0_92, %c0_93] : memref<16x8x128xf32, #tpu.memory_space<vmem>>, vector<1x8x128xf32>
    %178 = vector.shape_cast %177 : vector<1x8x128xf32> to vector<8x128xf32>
    %179 = arith.minimumf %178, %176 : vector<8x128xf32>
    %c12_94 = arith.constant 12 : index
    %c0_95 = arith.constant 0 : index
    %c0_96 = arith.constant 0 : index
    %180 = vector.load %arg5[%c12_94, %c0_95, %c0_96] : memref<16x8x128xf32, #tpu.memory_space<vmem>>, vector<1x8x128xf32>
    %181 = vector.shape_cast %180 : vector<1x8x128xf32> to vector<8x128xf32>
    %182 = vector.shape_cast %179 : vector<8x128xf32> to vector<1x8x128xf32>
    tpu.vector_store %arg5[%c12_94, %c0_95, %c0_96], %182 {strides = array<i32>} : memref<16x8x128xf32, #tpu.memory_space<vmem>>, vector<1x8x128xf32>,
    %183 = vector.broadcast %30 : f32 to vector<1x8x128xf32>
    %184 = arith.subf %40, %183 : vector<1x8x128xf32>
    %185 = arith.mulf %184, %184 : vector<1x8x128xf32>
    %186 = arith.minimumf %175, %185 : vector<1x8x128xf32>
    %cst_97 = arith.constant dense<0x7F800000> : vector<8x128xf32>
    %187 = vector.multi_reduction <minimumf>, %185, %cst_97 [0] : vector<1x8x128xf32> to vector<8x128xf32>
    %c13_98 = arith.constant 13 : index
    %c0_99 = arith.constant 0 : index
    %c0_100 = arith.constant 0 : index
    %188 = vector.load %arg5[%c13_98, %c0_99, %c0_100] : memref<16x8x128xf32, #tpu.memory_space<vmem>>, vector<1x8x128xf32>
    %189 = vector.shape_cast %188 : vector<1x8x128xf32> to vector<8x128xf32>
    %190 = arith.minimumf %189, %187 : vector<8x128xf32>
    %c13_101 = arith.constant 13 : index
    %c0_102 = arith.constant 0 : index
    %c0_103 = arith.constant 0 : index
    %191 = vector.load %arg5[%c13_101, %c0_102, %c0_103] : memref<16x8x128xf32, #tpu.memory_space<vmem>>, vector<1x8x128xf32>
    %192 = vector.shape_cast %191 : vector<1x8x128xf32> to vector<8x128xf32>
    %193 = vector.shape_cast %190 : vector<8x128xf32> to vector<1x8x128xf32>
    tpu.vector_store %arg5[%c13_101, %c0_102, %c0_103], %193 {strides = array<i32>} : memref<16x8x128xf32, #tpu.memory_space<vmem>>, vector<1x8x128xf32>,
    %194 = vector.broadcast %32 : f32 to vector<1x8x128xf32>
    %195 = arith.subf %40, %194 : vector<1x8x128xf32>
    %196 = arith.mulf %195, %195 : vector<1x8x128xf32>
    %197 = arith.minimumf %186, %196 : vector<1x8x128xf32>
    %cst_104 = arith.constant dense<0x7F800000> : vector<8x128xf32>
    %198 = vector.multi_reduction <minimumf>, %196, %cst_104 [0] : vector<1x8x128xf32> to vector<8x128xf32>
    %c14_105 = arith.constant 14 : index
    %c0_106 = arith.constant 0 : index
    %c0_107 = arith.constant 0 : index
    %199 = vector.load %arg5[%c14_105, %c0_106, %c0_107] : memref<16x8x128xf32, #tpu.memory_space<vmem>>, vector<1x8x128xf32>
    %200 = vector.shape_cast %199 : vector<1x8x128xf32> to vector<8x128xf32>
    %201 = arith.minimumf %200, %198 : vector<8x128xf32>
    %c14_108 = arith.constant 14 : index
    %c0_109 = arith.constant 0 : index
    %c0_110 = arith.constant 0 : index
    %202 = vector.load %arg5[%c14_108, %c0_109, %c0_110] : memref<16x8x128xf32, #tpu.memory_space<vmem>>, vector<1x8x128xf32>
    %203 = vector.shape_cast %202 : vector<1x8x128xf32> to vector<8x128xf32>
    %204 = vector.shape_cast %201 : vector<8x128xf32> to vector<1x8x128xf32>
    tpu.vector_store %arg5[%c14_108, %c0_109, %c0_110], %204 {strides = array<i32>} : memref<16x8x128xf32, #tpu.memory_space<vmem>>, vector<1x8x128xf32>,
    %205 = vector.broadcast %34 : f32 to vector<1x8x128xf32>
    %206 = arith.subf %40, %205 : vector<1x8x128xf32>
    %207 = arith.mulf %206, %206 : vector<1x8x128xf32>
    %208 = arith.minimumf %197, %207 : vector<1x8x128xf32>
    %cst_111 = arith.constant dense<0x7F800000> : vector<8x128xf32>
    %209 = vector.multi_reduction <minimumf>, %207, %cst_111 [0] : vector<1x8x128xf32> to vector<8x128xf32>
    %c15_112 = arith.constant 15 : index
    %c0_113 = arith.constant 0 : index
    %c0_114 = arith.constant 0 : index
    %210 = vector.load %arg5[%c15_112, %c0_113, %c0_114] : memref<16x8x128xf32, #tpu.memory_space<vmem>>, vector<1x8x128xf32>
    %211 = vector.shape_cast %210 : vector<1x8x128xf32> to vector<8x128xf32>
    %212 = arith.minimumf %211, %209 : vector<8x128xf32>
    %c15_115 = arith.constant 15 : index
    %c0_116 = arith.constant 0 : index
    %c0_117 = arith.constant 0 : index
    %213 = vector.load %arg5[%c15_115, %c0_116, %c0_117] : memref<16x8x128xf32, #tpu.memory_space<vmem>>, vector<1x8x128xf32>
    %214 = vector.shape_cast %213 : vector<1x8x128xf32> to vector<8x128xf32>
    %215 = vector.shape_cast %212 : vector<8x128xf32> to vector<1x8x128xf32>
    tpu.vector_store %arg5[%c15_115, %c0_116, %c0_117], %215 {strides = array<i32>} : memref<16x8x128xf32, #tpu.memory_space<vmem>>, vector<1x8x128xf32>,
    %cst_118 = arith.constant 1.000000e-03 : f32
    %216 = vector.broadcast %cst_118 : f32 to vector<1x8x128xf32>
    %217 = arith.cmpf oge, %40, %216 : vector<1x8x128xf32>
    %c0_119 = arith.constant 0 : index
    %c0_120 = arith.constant 0 : index
    %218 = vector.load %arg6[%c0_119, %c0_120] : memref<8x128xf32, #tpu.memory_space<vmem>>, vector<8x128xf32>
    %cst_121 = arith.constant 0.000000e+00 : f32
    %219 = vector.broadcast %cst_121 : f32 to vector<1x8x128xf32>
    %220 = arith.select %217, %208, %219 : vector<1x8x128xi1>, vector<1x8x128xf32>
    %cst_122 = arith.constant dense<0.000000e+00> : vector<8x128xf32>
    %221 = vector.multi_reduction <add>, %220, %cst_122 [0] : vector<1x8x128xf32> to vector<8x128xf32>
    %222 = arith.addf %218, %221 : vector<8x128xf32>
    %c0_123 = arith.constant 0 : index
    %c0_124 = arith.constant 0 : index
    %223 = vector.load %arg6[%c0_123, %c0_124] : memref<8x128xf32, #tpu.memory_space<vmem>>, vector<8x128xf32>
    tpu.vector_store %arg6[%c0_123, %c0_124], %222 {strides = array<i32>} : memref<8x128xf32, #tpu.memory_space<vmem>>, vector<8x128xf32>,
    %c0_125 = arith.constant 0 : index
    %c0_126 = arith.constant 0 : index
    %224 = vector.load %arg7[%c0_125, %c0_126] : memref<8x128xf32, #tpu.memory_space<vmem>>, vector<8x128xf32>
    %225 = arith.extui %217 : vector<1x8x128xi1> to vector<1x8x128xi32>
    %226 = arith.sitofp %225 : vector<1x8x128xi32> to vector<1x8x128xf32>
    %cst_127 = arith.constant dense<0.000000e+00> : vector<8x128xf32>
    %227 = vector.multi_reduction <add>, %226, %cst_127 [0] : vector<1x8x128xf32> to vector<8x128xf32>
    %228 = arith.addf %224, %227 : vector<8x128xf32>
    %c0_128 = arith.constant 0 : index
    %c0_129 = arith.constant 0 : index
    %229 = vector.load %arg7[%c0_128, %c0_129] : memref<8x128xf32, #tpu.memory_space<vmem>>, vector<8x128xf32>
    tpu.vector_store %arg7[%c0_128, %c0_129], %228 {strides = array<i32>} : memref<8x128xf32, #tpu.memory_space<vmem>>, vector<8x128xf32>,
    %c0_i32_130 = arith.constant 0 : i32
    %230 = arith.cmpi eq, %arg1, %c0_i32_130 : i32
    %231 = arith.extui %230 : i1 to i32
    %c0_i32_131 = arith.constant 0 : i32
    %232 = arith.cmpi ne, %231, %c0_i32_131 : i32
    scf.if %232 {
      %c0_132 = arith.constant 0 : index
      %c0_133 = arith.constant 0 : index
      %c0_134 = arith.constant 0 : index
      %233 = vector.load %arg5[%c0_132, %c0_133, %c0_134] : memref<16x8x128xf32, #tpu.memory_space<vmem>>, vector<1x8x128xf32>
      %234 = vector.shape_cast %233 : vector<1x8x128xf32> to vector<8x128xf32>
      %235 = vector.shape_cast %234 : vector<8x128xf32> to vector<1x8x128xf32>
      %cst_135 = arith.constant dense<0x7F800000> : vector<1xf32>
      %236 = vector.multi_reduction <minimumf>, %235, %cst_135 [1, 2] : vector<1x8x128xf32> to vector<1xf32>
      %237 = vector.shape_cast %236 : vector<1xf32> to vector<1x1x1xf32>
      %238 = vector.extract %237[0, 0, 0] : f32 from vector<1x1x1xf32>
      %cst_136 = arith.constant 0.000000e+00 : f32
      %239 = arith.addf %cst_136, %238 : f32
      %c1_137 = arith.constant 1 : index
      %c0_138 = arith.constant 0 : index
      %c0_139 = arith.constant 0 : index
      %240 = vector.load %arg5[%c1_137, %c0_138, %c0_139] : memref<16x8x128xf32, #tpu.memory_space<vmem>>, vector<1x8x128xf32>
      %241 = vector.shape_cast %240 : vector<1x8x128xf32> to vector<8x128xf32>
      %242 = vector.shape_cast %241 : vector<8x128xf32> to vector<1x8x128xf32>
      %cst_140 = arith.constant dense<0x7F800000> : vector<1xf32>
      %243 = vector.multi_reduction <minimumf>, %242, %cst_140 [1, 2] : vector<1x8x128xf32> to vector<1xf32>
      %244 = vector.shape_cast %243 : vector<1xf32> to vector<1x1x1xf32>
      %245 = vector.extract %244[0, 0, 0] : f32 from vector<1x1x1xf32>
      %246 = arith.addf %239, %245 : f32
      %c2_141 = arith.constant 2 : index
      %c0_142 = arith.constant 0 : index
      %c0_143 = arith.constant 0 : index
      %247 = vector.load %arg5[%c2_141, %c0_142, %c0_143] : memref<16x8x128xf32, #tpu.memory_space<vmem>>, vector<1x8x128xf32>
      %248 = vector.shape_cast %247 : vector<1x8x128xf32> to vector<8x128xf32>
      %249 = vector.shape_cast %248 : vector<8x128xf32> to vector<1x8x128xf32>
      %cst_144 = arith.constant dense<0x7F800000> : vector<1xf32>
      %250 = vector.multi_reduction <minimumf>, %249, %cst_144 [1, 2] : vector<1x8x128xf32> to vector<1xf32>
      %251 = vector.shape_cast %250 : vector<1xf32> to vector<1x1x1xf32>
      %252 = vector.extract %251[0, 0, 0] : f32 from vector<1x1x1xf32>
      %253 = arith.addf %246, %252 : f32
      %c3_145 = arith.constant 3 : index
      %c0_146 = arith.constant 0 : index
      %c0_147 = arith.constant 0 : index
      %254 = vector.load %arg5[%c3_145, %c0_146, %c0_147] : memref<16x8x128xf32, #tpu.memory_space<vmem>>, vector<1x8x128xf32>
      %255 = vector.shape_cast %254 : vector<1x8x128xf32> to vector<8x128xf32>
      %256 = vector.shape_cast %255 : vector<8x128xf32> to vector<1x8x128xf32>
      %cst_148 = arith.constant dense<0x7F800000> : vector<1xf32>
      %257 = vector.multi_reduction <minimumf>, %256, %cst_148 [1, 2] : vector<1x8x128xf32> to vector<1xf32>
      %258 = vector.shape_cast %257 : vector<1xf32> to vector<1x1x1xf32>
      %259 = vector.extract %258[0, 0, 0] : f32 from vector<1x1x1xf32>
      %260 = arith.addf %253, %259 : f32
      %c4_149 = arith.constant 4 : index
      %c0_150 = arith.constant 0 : index
      %c0_151 = arith.constant 0 : index
      %261 = vector.load %arg5[%c4_149, %c0_150, %c0_151] : memref<16x8x128xf32, #tpu.memory_space<vmem>>, vector<1x8x128xf32>
      %262 = vector.shape_cast %261 : vector<1x8x128xf32> to vector<8x128xf32>
      %263 = vector.shape_cast %262 : vector<8x128xf32> to vector<1x8x128xf32>
      %cst_152 = arith.constant dense<0x7F800000> : vector<1xf32>
      %264 = vector.multi_reduction <minimumf>, %263, %cst_152 [1, 2] : vector<1x8x128xf32> to vector<1xf32>
      %265 = vector.shape_cast %264 : vector<1xf32> to vector<1x1x1xf32>
      %266 = vector.extract %265[0, 0, 0] : f32 from vector<1x1x1xf32>
      %267 = arith.addf %260, %266 : f32
      %c5_153 = arith.constant 5 : index
      %c0_154 = arith.constant 0 : index
      %c0_155 = arith.constant 0 : index
      %268 = vector.load %arg5[%c5_153, %c0_154, %c0_155] : memref<16x8x128xf32, #tpu.memory_space<vmem>>, vector<1x8x128xf32>
      %269 = vector.shape_cast %268 : vector<1x8x128xf32> to vector<8x128xf32>
      %270 = vector.shape_cast %269 : vector<8x128xf32> to vector<1x8x128xf32>
      %cst_156 = arith.constant dense<0x7F800000> : vector<1xf32>
      %271 = vector.multi_reduction <minimumf>, %270, %cst_156 [1, 2] : vector<1x8x128xf32> to vector<1xf32>
      %272 = vector.shape_cast %271 : vector<1xf32> to vector<1x1x1xf32>
      %273 = vector.extract %272[0, 0, 0] : f32 from vector<1x1x1xf32>
      %274 = arith.addf %267, %273 : f32
      %c6_157 = arith.constant 6 : index
      %c0_158 = arith.constant 0 : index
      %c0_159 = arith.constant 0 : index
      %275 = vector.load %arg5[%c6_157, %c0_158, %c0_159] : memref<16x8x128xf32, #tpu.memory_space<vmem>>, vector<1x8x128xf32>
      %276 = vector.shape_cast %275 : vector<1x8x128xf32> to vector<8x128xf32>
      %277 = vector.shape_cast %276 : vector<8x128xf32> to vector<1x8x128xf32>
      %cst_160 = arith.constant dense<0x7F800000> : vector<1xf32>
      %278 = vector.multi_reduction <minimumf>, %277, %cst_160 [1, 2] : vector<1x8x128xf32> to vector<1xf32>
      %279 = vector.shape_cast %278 : vector<1xf32> to vector<1x1x1xf32>
      %280 = vector.extract %279[0, 0, 0] : f32 from vector<1x1x1xf32>
      %281 = arith.addf %274, %280 : f32
      %c7_161 = arith.constant 7 : index
      %c0_162 = arith.constant 0 : index
      %c0_163 = arith.constant 0 : index
      %282 = vector.load %arg5[%c7_161, %c0_162, %c0_163] : memref<16x8x128xf32, #tpu.memory_space<vmem>>, vector<1x8x128xf32>
      %283 = vector.shape_cast %282 : vector<1x8x128xf32> to vector<8x128xf32>
      %284 = vector.shape_cast %283 : vector<8x128xf32> to vector<1x8x128xf32>
      %cst_164 = arith.constant dense<0x7F800000> : vector<1xf32>
      %285 = vector.multi_reduction <minimumf>, %284, %cst_164 [1, 2] : vector<1x8x128xf32> to vector<1xf32>
      %286 = vector.shape_cast %285 : vector<1xf32> to vector<1x1x1xf32>
      %287 = vector.extract %286[0, 0, 0] : f32 from vector<1x1x1xf32>
      %288 = arith.addf %281, %287 : f32
      %c8_165 = arith.constant 8 : index
      %c0_166 = arith.constant 0 : index
      %c0_167 = arith.constant 0 : index
      %289 = vector.load %arg5[%c8_165, %c0_166, %c0_167] : memref<16x8x128xf32, #tpu.memory_space<vmem>>, vector<1x8x128xf32>
      %290 = vector.shape_cast %289 : vector<1x8x128xf32> to vector<8x128xf32>
      %291 = vector.shape_cast %290 : vector<8x128xf32> to vector<1x8x128xf32>
      %cst_168 = arith.constant dense<0x7F800000> : vector<1xf32>
      %292 = vector.multi_reduction <minimumf>, %291, %cst_168 [1, 2] : vector<1x8x128xf32> to vector<1xf32>
      %293 = vector.shape_cast %292 : vector<1xf32> to vector<1x1x1xf32>
      %294 = vector.extract %293[0, 0, 0] : f32 from vector<1x1x1xf32>
      %295 = arith.addf %288, %294 : f32
      %c9_169 = arith.constant 9 : index
      %c0_170 = arith.constant 0 : index
      %c0_171 = arith.constant 0 : index
      %296 = vector.load %arg5[%c9_169, %c0_170, %c0_171] : memref<16x8x128xf32, #tpu.memory_space<vmem>>, vector<1x8x128xf32>
      %297 = vector.shape_cast %296 : vector<1x8x128xf32> to vector<8x128xf32>
      %298 = vector.shape_cast %297 : vector<8x128xf32> to vector<1x8x128xf32>
      %cst_172 = arith.constant dense<0x7F800000> : vector<1xf32>
      %299 = vector.multi_reduction <minimumf>, %298, %cst_172 [1, 2] : vector<1x8x128xf32> to vector<1xf32>
      %300 = vector.shape_cast %299 : vector<1xf32> to vector<1x1x1xf32>
      %301 = vector.extract %300[0, 0, 0] : f32 from vector<1x1x1xf32>
      %302 = arith.addf %295, %301 : f32
      %c10_173 = arith.constant 10 : index
      %c0_174 = arith.constant 0 : index
      %c0_175 = arith.constant 0 : index
      %303 = vector.load %arg5[%c10_173, %c0_174, %c0_175] : memref<16x8x128xf32, #tpu.memory_space<vmem>>, vector<1x8x128xf32>
      %304 = vector.shape_cast %303 : vector<1x8x128xf32> to vector<8x128xf32>
      %305 = vector.shape_cast %304 : vector<8x128xf32> to vector<1x8x128xf32>
      %cst_176 = arith.constant dense<0x7F800000> : vector<1xf32>
      %306 = vector.multi_reduction <minimumf>, %305, %cst_176 [1, 2] : vector<1x8x128xf32> to vector<1xf32>
      %307 = vector.shape_cast %306 : vector<1xf32> to vector<1x1x1xf32>
      %308 = vector.extract %307[0, 0, 0] : f32 from vector<1x1x1xf32>
      %309 = arith.addf %302, %308 : f32
      %c11_177 = arith.constant 11 : index
      %c0_178 = arith.constant 0 : index
      %c0_179 = arith.constant 0 : index
      %310 = vector.load %arg5[%c11_177, %c0_178, %c0_179] : memref<16x8x128xf32, #tpu.memory_space<vmem>>, vector<1x8x128xf32>
      %311 = vector.shape_cast %310 : vector<1x8x128xf32> to vector<8x128xf32>
      %312 = vector.shape_cast %311 : vector<8x128xf32> to vector<1x8x128xf32>
      %cst_180 = arith.constant dense<0x7F800000> : vector<1xf32>
      %313 = vector.multi_reduction <minimumf>, %312, %cst_180 [1, 2] : vector<1x8x128xf32> to vector<1xf32>
      %314 = vector.shape_cast %313 : vector<1xf32> to vector<1x1x1xf32>
      %315 = vector.extract %314[0, 0, 0] : f32 from vector<1x1x1xf32>
      %316 = arith.addf %309, %315 : f32
      %c12_181 = arith.constant 12 : index
      %c0_182 = arith.constant 0 : index
      %c0_183 = arith.constant 0 : index
      %317 = vector.load %arg5[%c12_181, %c0_182, %c0_183] : memref<16x8x128xf32, #tpu.memory_space<vmem>>, vector<1x8x128xf32>
      %318 = vector.shape_cast %317 : vector<1x8x128xf32> to vector<8x128xf32>
      %319 = vector.shape_cast %318 : vector<8x128xf32> to vector<1x8x128xf32>
      %cst_184 = arith.constant dense<0x7F800000> : vector<1xf32>
      %320 = vector.multi_reduction <minimumf>, %319, %cst_184 [1, 2] : vector<1x8x128xf32> to vector<1xf32>
      %321 = vector.shape_cast %320 : vector<1xf32> to vector<1x1x1xf32>
      %322 = vector.extract %321[0, 0, 0] : f32 from vector<1x1x1xf32>
      %323 = arith.addf %316, %322 : f32
      %c13_185 = arith.constant 13 : index
      %c0_186 = arith.constant 0 : index
      %c0_187 = arith.constant 0 : index
      %324 = vector.load %arg5[%c13_185, %c0_186, %c0_187] : memref<16x8x128xf32, #tpu.memory_space<vmem>>, vector<1x8x128xf32>
      %325 = vector.shape_cast %324 : vector<1x8x128xf32> to vector<8x128xf32>
      %326 = vector.shape_cast %325 : vector<8x128xf32> to vector<1x8x128xf32>
      %cst_188 = arith.constant dense<0x7F800000> : vector<1xf32>
      %327 = vector.multi_reduction <minimumf>, %326, %cst_188 [1, 2] : vector<1x8x128xf32> to vector<1xf32>
      %328 = vector.shape_cast %327 : vector<1xf32> to vector<1x1x1xf32>
      %329 = vector.extract %328[0, 0, 0] : f32 from vector<1x1x1xf32>
      %330 = arith.addf %323, %329 : f32
      %c14_189 = arith.constant 14 : index
      %c0_190 = arith.constant 0 : index
      %c0_191 = arith.constant 0 : index
      %331 = vector.load %arg5[%c14_189, %c0_190, %c0_191] : memref<16x8x128xf32, #tpu.memory_space<vmem>>, vector<1x8x128xf32>
      %332 = vector.shape_cast %331 : vector<1x8x128xf32> to vector<8x128xf32>
      %333 = vector.shape_cast %332 : vector<8x128xf32> to vector<1x8x128xf32>
      %cst_192 = arith.constant dense<0x7F800000> : vector<1xf32>
      %334 = vector.multi_reduction <minimumf>, %333, %cst_192 [1, 2] : vector<1x8x128xf32> to vector<1xf32>
      %335 = vector.shape_cast %334 : vector<1xf32> to vector<1x1x1xf32>
      %336 = vector.extract %335[0, 0, 0] : f32 from vector<1x1x1xf32>
      %337 = arith.addf %330, %336 : f32
      %c15_193 = arith.constant 15 : index
      %c0_194 = arith.constant 0 : index
      %c0_195 = arith.constant 0 : index
      %338 = vector.load %arg5[%c15_193, %c0_194, %c0_195] : memref<16x8x128xf32, #tpu.memory_space<vmem>>, vector<1x8x128xf32>
      %339 = vector.shape_cast %338 : vector<1x8x128xf32> to vector<8x128xf32>
      %340 = vector.shape_cast %339 : vector<8x128xf32> to vector<1x8x128xf32>
      %cst_196 = arith.constant dense<0x7F800000> : vector<1xf32>
      %341 = vector.multi_reduction <minimumf>, %340, %cst_196 [1, 2] : vector<1x8x128xf32> to vector<1xf32>
      %342 = vector.shape_cast %341 : vector<1xf32> to vector<1x1x1xf32>
      %343 = vector.extract %342[0, 0, 0] : f32 from vector<1x1x1xf32>
      %344 = arith.addf %337, %343 : f32
      %cst_197 = arith.constant 1.600000e+01 : f32
      %345 = arith.divf %344, %cst_197 : f32
      %c0_198 = arith.constant 0 : index
      %c0_199 = arith.constant 0 : index
      %346 = vector.load %arg6[%c0_198, %c0_199] : memref<8x128xf32, #tpu.memory_space<vmem>>, vector<8x128xf32>
      %347 = vector.shape_cast %346 : vector<8x128xf32> to vector<1x8x128xf32>
      %cst_200 = arith.constant dense<0.000000e+00> : vector<1xf32>
      %348 = vector.multi_reduction <add>, %347, %cst_200 [1, 2] : vector<1x8x128xf32> to vector<1xf32>
      %349 = vector.shape_cast %348 : vector<1xf32> to vector<1x1x1xf32>
      %350 = vector.extract %349[0, 0, 0] : f32 from vector<1x1x1xf32>
      %c0_201 = arith.constant 0 : index
      %c0_202 = arith.constant 0 : index
      %351 = vector.load %arg7[%c0_201, %c0_202] : memref<8x128xf32, #tpu.memory_space<vmem>>, vector<8x128xf32>
      %352 = vector.shape_cast %351 : vector<8x128xf32> to vector<1x8x128xf32>
      %cst_203 = arith.constant dense<0.000000e+00> : vector<1xf32>
      %353 = vector.multi_reduction <add>, %352, %cst_203 [1, 2] : vector<1x8x128xf32> to vector<1xf32>
      %354 = vector.shape_cast %353 : vector<1xf32> to vector<1x1x1xf32>
      %355 = vector.extract %354[0, 0, 0] : f32 from vector<1x1x1xf32>
      %356 = arith.divf %350, %355 : f32
      %357 = arith.addf %345, %356 : f32
      %358 = vector.broadcast %357 : f32 to vector<1x1x128xf32>
      %c0_204 = arith.constant 0 : index
      %c0_205 = arith.constant 0 : index
      %c0_206 = arith.constant 0 : index
      %359 = vector.load %arg4[%c0_204, %c0_205, %c0_206] : memref<1x1x128xf32, #tpu.memory_space<vmem>>, vector<1x1x128xf32>
      tpu.vector_store %arg4[%c0_204, %c0_205, %c0_206], %358 {strides = array<i32>} : memref<1x1x128xf32, #tpu.memory_space<vmem>>, vector<1x1x128xf32>,
    } else {
    }
    return
  }
  func.func @transform_0(%arg0: i32, %arg1: i32) -> (i32, i32) {
    %c0_i32 = arith.constant 0 : i32
    %c0_i32_0 = arith.constant 0 : i32
    %c0_i32_1 = arith.constant 0 : i32
    return %c0_i32, %c0_i32_0 : i32, i32
  }
  func.func @transform_1(%arg0: i32, %arg1: i32) -> (i32, i32, i32, i32) {
    %c0_i32 = arith.constant 0 : i32
    %c0_i32_0 = arith.constant 0 : i32
    %c0_i32_1 = arith.constant 0 : i32
    return %arg0, %arg1, %c0_i32, %c0_i32_0 : i32, i32, i32, i32
  }
  func.func @transform_2(%arg0: i32, %arg1: i32) -> (i32, i32, i32) {
    %c0_i32 = arith.constant 0 : i32
    %c0_i32_0 = arith.constant 0 : i32
    %c0_i32_1 = arith.constant 0 : i32
    return %arg0, %c0_i32, %c0_i32_0 : i32, i32, i32
  }
}

</mosaic_0001>

<bundles_post_ra>
// kernel: tpu_custom_call.1
= control target key start
LH: loop header
LB: loop body
LE: loop exit
PB: predicated region body
PF: predicated region fallthrough
CT: control target
= control target key end

     0   :  { %s1257_s0 = inlined_call_operand.hbm [shape: f32[2,16], index: 0, kind: input, shape index: {}]   ;;  %s1258_s1 = inlined_call_operand.hbm [shape: f32[2,1,8,128], index: 1, kind: input, shape index: {}]   ;;  %s1259_s2 = inlined_call_operand.hbm [shape: f32[2,1,128], index: 2, kind: output, shape index: {}]  }
   0x1   :  { %1275 = sst [smem:[#allocation23_spill]] %s1257_s0 }
   0x2   :  { %1276 = sst [smem:[#allocation24_spill]] %s1258_s1 }
   0x3   :  { %1277 = sst [smem:[#allocation25_spill]] %s1259_s2 }
   0x4   :  { %7 = vsyncpa [#allocation8], 0 }
   0x5   :  { %8 = vsyncpa [#allocation6], 0 }
   0x6   :  { %10 = vsyncpa [#allocation6 + $0x1], 0 }
   0x7   :  { %11 = vsyncpa [#allocation7], 0 }
   0x8   :  { %13 = vsyncpa [#allocation7 + $0x1], 0  ;;  %s968_s9 = smov 0   ;;  %s970_s10 = smov 0  }
   0x9   :  { %s972_s11 = smov 0   ;;  %s974_s12 = smov 0  }
   0xa   :  { %s976_s13 = smov 0   ;;  %s978_s14 = smov 0  }
   0xb LB: > { %1278 = sst [smem:[#allocation14_spill]] %s927_s9  ;;  %s689_s15 = sadd.s32 4294967295, %s947_s14   ;;  %s947_s14 = sphi %s978_s14, %s19_s14   ;;  %s943_s13 = sphi %s976_s13, %s1313_s13   ;;  %s939_s12 = sphi %s974_s12, %s1312_s12   ;;  %s935_s11 = sphi %s972_s11, %s1311_s11   ;;  %s931_s10 = sphi %s970_s10, %s1310_s10   ;;  %s927_s9 = sphi %s968_s9, %s1309_s9  }
   0xc   : > { %1279 = sst [smem:[#allocation15_spill]] %s931_s10  ;;  %s690_s16 = sadd.s32 4294967294, %s947_s14  }
   0xd   : > { %1280 = sst [smem:[#allocation16_spill]] %s935_s11  ;;  %p74_p0 = scmp.ne.s32.totalorder %s931_s10, %s927_s9 }
   0xe   : > { %1281 = sst [smem:[#allocation17_spill]] %s943_s13  ;;  %p1002_p1 = scmp.eq.s32.totalorder %s689_s15, 0 }
   0xf   : > { %1282 = sst [smem:[#allocation18_spill]] %s947_s14  ;;  %p1006_p2 = scmp.eq.s32.totalorder %s689_s15, 1 }
  0x10   : > { %s1283_s17 = scalar_select %p1002_p1, 1, 0 }
  0x11   : > { %p104_p3 = scmp.eq.s32.totalorder %s690_s16, 1  ;;  %p1012_p4 = por %p1002_p1, %p74_p0 }
  0x12   : > { %p691_p5 = scmp.ge.s32.totalorder %s947_s14, 1  ;;  %p111_p7 = scmp.lt.s32.totalorder %s947_s14, 3 }
  0x13   : > { %s1285_s19 = scalar_select %p1012_p4, 1, 0 }
  0x14   : > { %p1017_p6 = por %p104_p3, %p74_p0  ;;  %p1022_p8 = pnand %p691_p5, %p111_p7 }
  0x15   : > { %s31_s22 = sadd.s32 1, %s943_s13  ;;  %s61_s25 = sadd.s32 1, %s935_s11 }
  0x16   : > { %s1286_s20 = scalar_select %p1017_p6, 1, 0 }
  0x17   : > { %p750_p10 = pneg %p1022_p8  ;;  %p1036_p12 = scmp.ge.s32.totalorder %s31_s22, 2 }
  0x18   : > { %1287 = sst [smem:[#allocation19_spill]] %s1286_s20  ;;  %p68_p13 = scmp.ne.s32.totalorder %s935_s11, %s931_s10 }
  0x19   : > { %p1032_p11 = pnand %p750_p10, %p1002_p1  ;;  %p69_p0 = scmp.eq.s32.totalorder %s947_s14, 0 }
  0x1a   : > { %s1291_s0 = sld [smem:[#allocation23_spill]] }
  0x1b   : > { %p820_p5 = pneg %p1032_p11 }
  0x20   : > { %s818_s28 = scalar_lea.hbm %s1291_s0, 32 }
  0x21   : > { %p819_p3 = scmp.ne.s32.totalorder %s1291_s0, %s818_s28  ;;  %p825_p9 = scmp.lt.u32.totalorder %s818_s28, %s1291_s0 }
  0x23   : > { %p821_p7 = pnand %p820_p5, %p819_p3 }
  0x25   : > { %p822_p10 = pneg %p821_p7 }
  0x27   : > { %p827_p6 = pnand %p825_p9, %p822_p10 }
  0x29   : > { %830 = shalt.err (!%p827_p6)
}
  0x2a   : > { %s949_s5 = smov [#allocation5]   ;;  %s1315_s22 = smov (%p1036_p12, %s31_s22), 0 }
  0x2b   : > { %753 = dma.hbm_to_smem (!%p1032_p11), %s1291_s0, 32, %s949_s5, [#allocation8]  }
  0x2c   : > { %1292 = sst [smem:[#allocation20_spill]] %s1315_s22  ;;  %p1067_p6 = por %p69_p0, %p68_p13 }
  0x2d   : > { %p1076_p9 = por %p1006_p2, %p68_p13  ;;  %s56_s16 = ssub.s32 %s943_s13, %s1315_s22 }
  0x2e   : > { %p763_p3 = scmp.lt.s32.totalorder %s947_s14, 2  ;;  %p59_p5 = scmp.eq.s32.totalorder %s56_s16, 0 }
  0x2f   : > { %s1294_s15 = scalar_select %p1076_p9, 1, 0 }
  0x30   : > { %s133_s23 = sand.u32 1, %s935_s11   ;;  %s695_s27 = sshll.u32 %s943_s13, 7 }
  0x31   : > { %1295 = sst [smem:[#allocation21_spill]] %s1294_s15  ;;  %s694_s24 = sshll.u32 %s133_s23, 3 }
  0x32   : > { %s1085_s26 = scalar_select %p59_p5, %s935_s11, %s61_s25  }
  0x33   : > { %s1297_s1 = sld [smem:[#allocation24_spill]]  ;;  %s137_s18 = scalar_lea.vmem [#allocation9], %s694_s24 }
  0x34   : > { %1296 = sst [smem:[#allocation22_spill]] %s1085_s26  ;;  %s145_s3 = sshll.u32 %s137_s18, 4  ;;  %s1093_s3 = int_to_ptr.vmem [resolvable:$true] %s145_s3 }
  0x35   : > { %p1097_p2 = pnand %p763_p3, %p1067_p6  ;;  %s134_s25 = scalar_lea.sflag [#allocation6], %s133_s23 }
  0x37   : > { %p833_p12 = pneg %p1097_p2 }
  0x39   : > { %s1091_s30 = scalar_lea.hbm %s1297_s1, %s695_s27  ;;  %s836_s16 = scalar_lea.hbm %s1297_s1, 256 }
  0x3a   : > { %s831_s5 = scalar_lea.hbm %s1091_s30, 128  ;;  %p837_p7 = scmp.lt.u32.totalorder %s1091_s30, %s1297_s1 }
  0x3b   : > { %p832_p11 = scmp.ne.s32.totalorder %s1091_s30, %s831_s5  ;;  %p838_p10 = scmp.lt.u32.totalorder %s836_s16, %s831_s5 }
  0x3c   : > { %p840_p3 = scmp.lt.u32.totalorder %s831_s5, %s1091_s30 }
  0x3d   : > { %p834_p13 = pnand %p833_p12, %p832_p11  ;;  %p839_p6 = por %p838_p10, %p837_p7 }
  0x3f   : > { %p835_p0 = pneg %p834_p13  ;;  %p841_p5 = por %p840_p3, %p839_p6 }
  0x41   : > { %p842_p9 = pnand %p841_p5, %p835_p0 }
  0x43   : > { %845 = shalt.err (!%p842_p9)
}
  0x44   : > { %s846_s23 = scalar_lea.vmem %s1093_s3, 128  ;;  %s950_s27 = smov [#allocation9]  }
  0x45   : > { %p847_p11 = scmp.ne.s32.totalorder %s1093_s3, %s846_s23  ;;  %s851_s28 = sshll.u32 %s950_s27, 4  ;;  %s852_s28 = int_to_ptr.vmem [resolvable:$false] %s851_s28 }
  0x46   : > { %s853_s29 = scalar_lea.vmem %s852_s28, 256  ;;  %p854_p1 = scmp.lt.s32.totalorder %s1093_s3, %s852_s28 }
  0x47   : > { %p849_p13 = pnand %p847_p11, %p833_p12  ;;  %p855_p7 = scmp.lt.s32.totalorder %s853_s29, %s846_s23 }
  0x49   : > { %p850_p4 = pneg %p849_p13  ;;  %p856_p10 = por %p855_p7, %p854_p1 }
  0x4b   : > { %p857_p6 = pnand %p856_p10, %p850_p4 }
  0x4d   : > { %860 = shalt.err (!%p857_p6)
}
  0x4e   : > { %757 = dma.hbm_to_vmem [thread:$0]  (!%p1097_p2), %s1091_s30, 128, %s1093_s3, %s134_s25  }
  0x4f   : > { %154 = sbr.rel (%p1022_p8) target bundleno = 424 (0x1a8), region = 28  ;;  %p1299_p9 = scmp.ne.s32.totalorder (!%p1022_p8), %s1283_s17, 0 }
  0x56   : > { %914 = dma.done.wait (%p1299_p9), [#allocation8], 32  }
  0x57   : > { %916 = vsyncadd (%p1299_p9), [#allocation8], 4294967264  ;;  %s1133_s18 = sand.u32 1, %s931_s10   ;;  %p1300_p1 = scmp.ne.s32.totalorder %s1285_s19, 0 }
  0x58   : > { %s698_s5 = sshll.u32 %s1133_s18, 3  ;;  %s161_s4 = scalar_lea.sflag [#allocation6], %s1133_s18 }
  0x59   : > { %s164_s6 = scalar_lea.vmem [#allocation9], %s698_s5 }
  0x5a   : > { %918 = dma.done.wait (%p1300_p1), %s161_s4, 128  }
  0x5b   : > { %920 = vsyncadd (%p1300_p1), %s161_s4, 4294967168 }
  0x5c   : > { %169 = sfence }
  0x5d   : > { %s1142_s21 = sshll.u32 %s939_s12, 7  ;;  %v239_v0 = vld [vmem:[%s164_s6] sm:$0xff] }
  0x5e   : > { %s208_s17 = sld [smem:[#allocation5 + %s1142_s21]]  ;;  %s211_s30 = sadd.s32 2, %s1142_s21  ;;  %vm240_vm0 = vcmp.ge.f32.partialorder %v239_v0, 0.001 }
  0x5f   : > { %s212_s3 = sld [smem:[#allocation5 + %s211_s30]]  ;;  %s209_s25 = sadd.s32 1, %s1142_s21  ;;  %v1149_v1 = vsel %vm240_vm0, %v239_v0, -inf }
  0x60   : > { %s210_s19 = sld [smem:[#allocation5 + %s209_s25]]  ;;  %s213_s7 = sadd.s32 3, %s1142_s21  ;;  %vm368_vm1 = vcmp.ge.f32.partialorder %v1149_v1, 0.001 }
  0x61   : > { %s214_s16 = sld [smem:[#allocation5 + %s213_s7]]  ;;  %s215_s8 = sadd.s32 4, %s1142_s21 }
  0x62   : > { %s216_s24 = sld [smem:[#allocation5 + %s215_s8]]  ;;  %s217_s23 = sadd.s32 5, %s1142_s21 }
  0x63   : > { %s218_s27 = sld [smem:[#allocation5 + %s217_s23]]  ;;  %s219_s28 = sadd.s32 6, %s1142_s21 }
  0x64   : > { %v242_v2 = vstv %s208_s17  ;;  %s1153_s29 = sld [smem:[#allocation5 + %s219_s28]]  ;;  %s221_s5 = sadd.s32 7, %s1142_s21 }
  0x65   : > { %v243_v3 = vsub.f32 %v1149_v1, %v242_v2  ;;  %v256_v4 = vstv %s212_s3  ;;  %s1157_s4 = sld [smem:[#allocation5 + %s221_s5]]  ;;  %s223_s6 = sadd.s32 8, %s1142_s21  ;;  %v951_v2 = vmov 0.0  }
  0x66   : > { %v257_v5 = vsub.f32 %v1149_v1, %v256_v4  ;;  %v248_v6 = vstv %s210_s19  ;;  %s1161_s30 = sld [smem:[#allocation5 + %s223_s6]]  ;;  %s225_s25 = sadd.s32 9, %s1142_s21 }
  0x67   : > { %v244_v7 = vmul.f32 %v243_v3, %v243_v3  ;;  %v249_v8 = vsub.f32 %v1149_v1, %v248_v6  ;;  %v264_v9 = vstv %s214_s16  ;;  %s1165_s17 = sld [smem:[#allocation5 + %s225_s25]]  ;;  %s227_s7 = sadd.s32 10, %s1142_s21  ;;  %v700_v3 = vsel %vm368_vm1, 1.0, %v951_v2 }
  0x68   : > { %v258_v10 = vmul.f32 %v257_v5, %v257_v5  ;;  %v265_v11 = vsub.f32 %v1149_v1, %v264_v9  ;;  %v272_v12 = vstv %s216_s24  ;;  %s229_s3 = sadd.s32 11, %s1142_s21  ;;  %s1173_s19 = sld [smem:[#allocation5 + %s227_s7]] }
  0x69   : > { %384 = vmin.xlane.f32.xlu0 %v244_v7  ;;  %v250_v13 = vmul.f32 %v249_v8, %v249_v8  ;;  %v273_v14 = vsub.f32 %v1149_v1, %v272_v12  ;;  %v280_v15 = vstv %s218_s27  ;;  %s1176_s16 = sld [smem:[#allocation5 + %s229_s3]]  ;;  %s231_s8 = sadd.s32 12, %s1142_s21 }
  0x6a   : > { %406 = vmin.xlane.f32.xlu1 %v258_v10  ;;  %v266_v16 = vmul.f32 %v265_v11, %v265_v11  ;;  %v281_v17 = vsub.f32 %v1149_v1, %v280_v15  ;;  %v288_v18 = vstv %s1153_s29  ;;  %s233_s24 = sadd.s32 13, %s1142_s21  ;;  %s1183_s23 = sld [smem:[#allocation5 + %s231_s8]] }
  0x6b   : > { %v251_v19 = vmin.f32 %v244_v7, %v250_v13  ;;  %v296_v20 = vstv %s1157_s4  ;;  %v274_v22 = vmul.f32 %v273_v14, %v273_v14  ;;  %v289_v23 = vsub.f32 %v1149_v1, %v288_v18  ;;  %s1186_s27 = sld [smem:[#allocation5 + %s233_s24]]  ;;  %s235_s28 = sadd.s32 14, %s1142_s21 }
  0x6c   : > { %v282_v24 = vmul.f32 %v281_v17, %v281_v17  ;;  %v297_v25 = vsub.f32 %v1149_v1, %v296_v20  ;;  %v304_v26 = vstv %s1161_s30  ;;  %s237_s29 = sadd.s32 15, %s1142_s21  ;;  %s236_s5 = sld [smem:[#allocation5 + %s235_s28]] }
  0x6d   : > { %395 = vmin.xlane.f32.xlu0 %v250_v13  ;;  %v259_v21 = vmin.f32 %v251_v19, %v258_v10  ;;  %v312_v28 = vstv %s1165_s17  ;;  %v290_v30 = vmul.f32 %v289_v23, %v289_v23  ;;  %v305_v31 = vsub.f32 %v1149_v1, %v304_v26  ;;  %s238_s4 = sld [smem:[#allocation5 + %s237_s29]] }
  0x6e   : > { %417 = vmin.xlane.f32.xlu1 %v266_v16  ;;  %v298_v32 = vmul.f32 %v297_v25, %v297_v25  ;;  %v313_v33 = vsub.f32 %v1149_v1, %v312_v28  ;;  %v320_v34 = vstv %s1173_s19 }
  0x6f   : > { %v267_v27 = vmin.f32 %v259_v21, %v266_v16  ;;  %v328_v36 = vstv %s1176_s16  ;;  %v306_v38 = vmul.f32 %v305_v31, %v305_v31  ;;  %v321_v39 = vsub.f32 %v1149_v1, %v320_v34 }
  0x70   : > { %v314_v40 = vmul.f32 %v313_v33, %v313_v33  ;;  %v329_v41 = vsub.f32 %v1149_v1, %v328_v36  ;;  %v336_v42 = vstv %s1183_s23 }
  0x71   : > { %428 = vmin.xlane.f32.xlu0 %v274_v22  ;;  %v275_v29 = vmin.f32 %v267_v27, %v274_v22  ;;  %v344_v44 = vstv %s1186_s27  ;;  %v322_v46 = vmul.f32 %v321_v39, %v321_v39  ;;  %v337_v47 = vsub.f32 %v1149_v1, %v336_v42 }
  0x72   : > { %439 = vmin.xlane.f32.xlu1 %v282_v24  ;;  %v330_v48 = vmul.f32 %v329_v41, %v329_v41  ;;  %v345_v49 = vsub.f32 %v1149_v1, %v344_v44  ;;  %v352_v50 = vstv %s236_s5 }
  0x73   : > { %v283_v35 = vmin.f32 %v275_v29, %v282_v24  ;;  %v360_v52 = vstv %s238_s4  ;;  %v338_v54 = vmul.f32 %v337_v47, %v337_v47  ;;  %v353_v55 = vsub.f32 %v1149_v1, %v352_v50 }
  0x74   : > { %v346_v56 = vmul.f32 %v345_v49, %v345_v49  ;;  %v361_v57 = vsub.f32 %v1149_v1, %v360_v52 }
  0x75   : > { %450 = vmin.xlane.f32.xlu0 %v290_v30  ;;  %v291_v37 = vmin.f32 %v283_v35, %v290_v30  ;;  %v354_v60 = vmul.f32 %v353_v55, %v353_v55 }
  0x76   : > { %461 = vmin.xlane.f32.xlu1 %v298_v32  ;;  %v362_v61 = vmul.f32 %v361_v57, %v361_v57 }
  0x77   : > { %v299_v43 = vmin.f32 %v291_v37, %v298_v32 }
  0x79   : > { %472 = vmin.xlane.f32.xlu0 %v306_v38  ;;  %v307_v45 = vmin.f32 %v299_v43, %v306_v38 }
  0x7a   : > { %483 = vmin.xlane.f32.xlu1 %v314_v40 }
  0x7b   : > { %v315_v51 = vmin.f32 %v307_v45, %v314_v40 }
  0x7d   : > { %494 = vmin.xlane.f32.xlu0 %v322_v46  ;;  %v323_v53 = vmin.f32 %v315_v51, %v322_v46 }
  0x7e   : > { %505 = vmin.xlane.f32.xlu1 %v330_v48 }
  0x7f   : > { %v331_v58 = vmin.f32 %v323_v53, %v330_v48 }
  0x81   : > { %516 = vmin.xlane.f32.xlu0 %v338_v54  ;;  %v339_v59 = vmin.f32 %v331_v58, %v338_v54 }
  0x82   : > { %527 = vmin.xlane.f32.xlu1 %v346_v56 }
  0x83   : > { %v347_v62 = vmin.f32 %v339_v59, %v346_v56 }
  0x85   : > { %538 = vmin.xlane.f32.xlu0 %v354_v60  ;;  %v355_v63 = vmin.f32 %v347_v62, %v354_v60 }
  0x86   : > { %549 = vmin.xlane.f32.xlu1 %v362_v61 }
  0x87   : > { %v363_v0 = vmin.f32 %v355_v63, %v362_v61 }
  0x89   : > { %v370_v4 = vsel %vm368_vm1, %v363_v0, 0.0 }
  0x8a   : > { %563 = vadd.xlane.f32.xlu0 %v370_v4  ;;  %573 = vadd.xlane.f32.xlu1 %v700_v3 }
  0xf6   : > { %v385_v5 = vpop.xlane.xlu0 %384 }
  0xf7   : > { %v386_v6 = vrot.slane %v385_v5, 4  ;;  %v407_v7 = vpop.xlane.xlu1 %406 }
  0xf8   : > { %v408_v8 = vrot.slane %v407_v7, 4 }
  0xf9   : > { %v387_v9 = vmin.f32 %v385_v5, %v386_v6 }
  0xfa   : > { %v409_v10 = vmin.f32 %v407_v7, %v408_v8  ;;  %v396_v11 = vpop.xlane.xlu0 %395 }
  0xfb   : > { %v388_v12 = vrot.slane %v387_v9, 2  ;;  %v397_v13 = vrot.slane %v396_v11, 4  ;;  %v418_v14 = vpop.xlane.xlu1 %417 }
  0xfc   : > { %v410_v1 = vrot.slane %v409_v10, 2  ;;  %v419_v15 = vrot.slane %v418_v14, 4 }
  0xfd   : > { %v398_v16 = vmin.f32 %v396_v11, %v397_v13  ;;  %v389_v17 = vmin.f32 %v387_v9, %v388_v12 }
  0xfe   : > { %v420_v18 = vmin.f32 %v418_v14, %v419_v15  ;;  %v429_v19 = vpop.xlane.xlu0 %428  ;;  %v411_v20 = vmin.f32 %v409_v10, %v410_v1 }
  0xff   : > { %v399_v21 = vrot.slane %v398_v16, 2  ;;  %v430_v22 = vrot.slane %v429_v19, 4  ;;  %v440_v23 = vpop.xlane.xlu1 %439  ;;  %v390_v24 = vrot.slane %v389_v17, 1 }
 0x100   : > { %v421_v25 = vrot.slane %v420_v18, 2  ;;  %v441_v26 = vrot.slane %v440_v23, 4  ;;  %v412_v32 = vrot.slane %v411_v20, 1 }
 0x101   : > { %v431_v27 = vmin.f32 %v429_v19, %v430_v22  ;;  %v391_v28 = vmin.f32 %v389_v17, %v390_v24  ;;  %v400_v29 = vmin.f32 %v398_v16, %v399_v21 }
 0x102   : > { %v442_v30 = vmin.f32 %v440_v23, %v441_v26  ;;  %v451_v31 = vpop.xlane.xlu0 %450  ;;  %v422_v33 = vmin.f32 %v420_v18, %v421_v25  ;;  %v413_v46 = vmin.f32 %v411_v20, %v412_v32 }
 0x103   : > { %v432_v34 = vrot.slane %v431_v27, 2  ;;  %v452_v35 = vrot.slane %v451_v31, 4  ;;  %v462_v36 = vpop.xlane.xlu1 %461  ;;  %704 = vpush %v391_v28  ;;  %v401_v37 = vrot.slane %v400_v29, 1 }
 0x104   : > { %v443_v38 = vrot.slane %v442_v30, 2  ;;  %v463_v39 = vrot.slane %v462_v36, 4  ;;  %v423_v40 = vrot.slane %v422_v33, 1 }
 0x105   : > { %v453_v41 = vmin.f32 %v451_v31, %v452_v35  ;;  %v402_v42 = vmin.f32 %v400_v29, %v401_v37  ;;  %v433_v43 = vmin.f32 %v431_v27, %v432_v34 }
 0x106   : > { %v464_v44 = vmin.f32 %v462_v36, %v463_v39  ;;  %v473_v45 = vpop.xlane.xlu0 %472  ;;  %v424_v47 = vmin.f32 %v422_v33, %v423_v40  ;;  %v444_v48 = vmin.f32 %v442_v30, %v443_v38 }
 0x107   : > { %v454_v49 = vrot.slane %v453_v41, 2  ;;  %v474_v50 = vrot.slane %v473_v45, 4  ;;  %v484_v51 = vpop.xlane.xlu1 %483  ;;  %706 = vpush %v402_v42  ;;  %v434_v52 = vrot.slane %v433_v43, 1 }
 0x108   : > { %v465_v53 = vrot.slane %v464_v44, 2  ;;  %v485_v54 = vrot.slane %v484_v51, 4  ;;  %708 = vpush %v413_v46  ;;  %v445_v55 = vrot.slane %v444_v48, 1 }
 0x109   : > { %v475_v56 = vmin.f32 %v473_v45, %v474_v50  ;;  %710 = vpush %v424_v47  ;;  %v435_v57 = vmin.f32 %v433_v43, %v434_v52  ;;  %v455_v58 = vmin.f32 %v453_v41, %v454_v49 }
 0x10a   : > { %v486_v59 = vmin.f32 %v484_v51, %v485_v54  ;;  %v495_v60 = vpop.xlane.xlu0 %494  ;;  %v446_v61 = vmin.f32 %v444_v48, %v445_v55  ;;  %v466_v62 = vmin.f32 %v464_v44, %v465_v53 }
 0x10b   : > { %v476_v63 = vrot.slane %v475_v56, 2  ;;  %v496_v0 = vrot.slane %v495_v60, 4  ;;  %v506_v2 = vpop.xlane.xlu1 %505  ;;  %712 = vpush %v435_v57  ;;  %v456_v3 = vrot.slane %v455_v58, 1 }
 0x10c   : > { %v487_v4 = vrot.slane %v486_v59, 2  ;;  %v507_v5 = vrot.slane %v506_v2, 4  ;;  %714 = vpush %v446_v61  ;;  %v467_v6 = vrot.slane %v466_v62, 1 }
 0x10d   : > { %v497_v7 = vmin.f32 %v495_v60, %v496_v0  ;;  %v457_v8 = vmin.f32 %v455_v58, %v456_v3  ;;  %v477_v9 = vmin.f32 %v475_v56, %v476_v63 }
 0x10e   : > { %v508_v10 = vmin.f32 %v506_v2, %v507_v5  ;;  %v517_v11 = vpop.xlane.xlu0 %516  ;;  %v468_v12 = vmin.f32 %v466_v62, %v467_v6  ;;  %v488_v13 = vmin.f32 %v486_v59, %v487_v4 }
 0x10f   : > { %v498_v14 = vrot.slane %v497_v7, 2  ;;  %v518_v1 = vrot.slane %v517_v11, 4  ;;  %v528_v15 = vpop.xlane.xlu1 %527  ;;  %716 = vpush %v457_v8  ;;  %v478_v16 = vrot.slane %v477_v9, 1 }
 0x110   : > { %v509_v17 = vrot.slane %v508_v10, 2  ;;  %v529_v18 = vrot.slane %v528_v15, 4  ;;  %718 = vpush %v468_v12  ;;  %v489_v19 = vrot.slane %v488_v13, 1 }
 0x111   : > { %v519_v20 = vmin.f32 %v517_v11, %v518_v1  ;;  %v479_v21 = vmin.f32 %v477_v9, %v478_v16  ;;  %v499_v22 = vmin.f32 %v497_v7, %v498_v14 }
 0x112   : > { %v530_v23 = vmin.f32 %v528_v15, %v529_v18  ;;  %v539_v24 = vpop.xlane.xlu0 %538  ;;  %v490_v25 = vmin.f32 %v488_v13, %v489_v19  ;;  %v510_v26 = vmin.f32 %v508_v10, %v509_v17 }
 0x113   : > { %v520_v27 = vrot.slane %v519_v20, 2  ;;  %v540_v28 = vrot.slane %v539_v24, 4  ;;  %v550_v29 = vpop.xlane.xlu1 %549  ;;  %720 = vpush %v479_v21  ;;  %v500_v30 = vrot.slane %v499_v22, 1 }
 0x114   : > { %v531_v31 = vrot.slane %v530_v23, 2  ;;  %v551_v32 = vrot.slane %v550_v29, 4  ;;  %722 = vpush %v490_v25  ;;  %v511_v33 = vrot.slane %v510_v26, 1 }
 0x115   : > { %v541_v34 = vmin.f32 %v539_v24, %v540_v28  ;;  %v501_v35 = vmin.f32 %v499_v22, %v500_v30  ;;  %v521_v36 = vmin.f32 %v519_v20, %v520_v27 }
 0x116   : > { %v552_v37 = vmin.f32 %v550_v29, %v551_v32  ;;  %v512_v38 = vmin.f32 %v510_v26, %v511_v33  ;;  %v532_v39 = vmin.f32 %v530_v23, %v531_v31 }
 0x117   : > { %v542_v40 = vrot.slane %v541_v34, 2  ;;  %v564_v41 = vpop.xlane.xlu0 %563  ;;  %v574_v42 = vpop.xlane.xlu1 %573  ;;  %724 = vpush %v501_v35  ;;  %v522_v43 = vrot.slane %v521_v36, 1 }
 0x118   : > { %v553_v44 = vrot.slane %v552_v37, 2  ;;  %v565_v45 = vrot.slane %v564_v41, 4  ;;  %v575_v46 = vrot.slane %v574_v42, 4  ;;  %726 = vpush %v512_v38  ;;  %v533_v47 = vrot.slane %v532_v39, 1 }
 0x119   : > { %v523_v48 = vmin.f32 %v521_v36, %v522_v43  ;;  %v543_v49 = vmin.f32 %v541_v34, %v542_v40 }
 0x11a   : > { %v566_v50 = vadd.f32 %v565_v45, %v564_v41  ;;  %v576_v51 = vadd.f32 %v575_v46, %v574_v42  ;;  %v534_v52 = vmin.f32 %v532_v39, %v533_v47  ;;  %v554_v53 = vmin.f32 %v552_v37, %v553_v44 }
 0x11b   : > { %728 = vpush %v523_v48  ;;  %v544_v54 = vrot.slane %v543_v49, 1 }
 0x11c   : > { %v567_v55 = vrot.slane %v566_v50, 2  ;;  %v577_v56 = vrot.slane %v576_v51, 2  ;;  %730 = vpush %v534_v52  ;;  %v555_v57 = vrot.slane %v554_v53, 1 }
 0x11d   : > { %v545_v58 = vmin.f32 %v543_v49, %v544_v54 }
 0x11e   : > { %v568_v59 = vadd.f32 %v567_v55, %v566_v50  ;;  %v578_v60 = vadd.f32 %v577_v56, %v576_v51  ;;  %v556_v61 = vmin.f32 %v554_v53, %v555_v57 }
 0x11f   : > { %732 = vpush %v545_v58 }
 0x120   : > { %734 = vpush %v556_v61  ;;  %v569_v62 = vrot.slane %v568_v59, 1  ;;  %v579_v63 = vrot.slane %v578_v60, 1 }
 0x122   : > { %v570_v0 = vadd.f32 %v569_v62, %v568_v59  ;;  %v580_v2 = vadd.f32 %v579_v63, %v578_v60 }
 0x124   : > { %736 = vpush %v570_v0 }
 0x125   : > { %738 = vpush %v580_v2 }
 0x134   : > { %s705_s21 = spop %704 }
 0x138   : > { %s707_s6 = spop %706 }
 0x139   : > { %s709_s30 = spop %708  ;;  %s404_s1 = sadd.f32 %s707_s6, %s705_s21 }
 0x13a   : > { %s711_s25 = spop %710 }
 0x13b   : > { %s415_s22 = sadd.f32 %s709_s30, %s404_s1  ;;  %s1301_s1 = sld [smem:[#allocation21_spill]] }
 0x13c   : > { %s713_s17 = spop %712 }
 0x13d   : > { %s715_s7 = spop %714  ;;  %s426_s13 = sadd.f32 %s711_s25, %s415_s22 }
 0x13e   : > { %s701_s22 = sshll.u32 %s939_s12, 4  ;;  %s952_s12 = smov [#allocation10]  }
 0x13f   : > { %s437_s26 = sadd.f32 %s713_s17, %s426_s13 }
 0x140   : > { %s717_s3 = spop %716 }
 0x141   : > { %s719_s19 = spop %718  ;;  %s448_s11 = sadd.f32 %s715_s7, %s437_s26 }
 0x142   : > { %s184_s7 = scalar_lea.vmem [#allocation10], %s1133_s18  ;;  %p1303_p8 = scmp.ne.s32.totalorder %s1301_s1, 0 }
 0x143   : > { %s459_s10 = sadd.f32 %s717_s3, %s448_s11  ;;  %s602_s26 = sshll.u32 %s184_s7, 4  ;;  %s1210_s26 = int_to_ptr.vmem [resolvable:$true] %s602_s26 }
 0x144   : > { %s721_s16 = spop %720 }
 0x145   : > { %s723_s8 = spop %722  ;;  %s470_s14 = sadd.f32 %s719_s19, %s459_s10 }
 0x146   : > { %s1302_s19 = sld [smem:[#allocation25_spill]] }
 0x147   : > { %s481_s20 = sadd.f32 %s721_s16, %s470_s14 }
 0x148   : > { %s725_s24 = spop %724 }
 0x149   : > { %s727_s23 = spop %726  ;;  %s492_s9 = sadd.f32 %s723_s8, %s481_s20 }
 0x14a   : > { %s865_s20 = sshll.u32 %s952_s12, 4  ;;  %s866_s20 = int_to_ptr.vmem [resolvable:$false] %s865_s20 }
 0x14b   : > { %s503_s2 = sadd.f32 %s725_s24, %s492_s9  ;;  %s861_s9 = scalar_lea.vmem %s1210_s26, 16 }
 0x14c   : > { %s729_s27 = spop %728  ;;  %s1208_s14 = scalar_lea.hbm %s1302_s19, %s701_s22 }
 0x14d   : > { %s731_s28 = spop %730  ;;  %s514_s15 = sadd.f32 %s727_s23, %s503_s2 }
 0x14e   : > { %s590_s2 = scalar_lea.sflag [#allocation7], %s1133_s18  ;;  %p862_p4 = scmp.ne.s32.totalorder %s1210_s26, %s861_s9 }
 0x14f   : > { %p868_p0 = scmp.lt.s32.totalorder %s1210_s26, %s866_s20 }
 0x150   : > { %s733_s29 = spop %732  ;;  %p863_p2 = pnand %p862_p4, %p1303_p8 }
 0x151   : > { %s735_s5 = spop %734 }
 0x152   : > { %p864_p12 = pneg %p863_p2 }
 0x155   : > { %s737_s4 = spop %736 }
 0x156   : > { %s739_s0 = spop %738 }
 0x157   : > { %v582_v3 = vstv %s739_s0  ;;  %s525_s0 = sadd.f32 %s729_s27, %s514_s15  ;;  %s867_s15 = scalar_lea.vmem %s866_s20, 32 }
 0x158   : > { %816 = vrcp.f32 %v582_v3  ;;  %p869_p3 = scmp.lt.s32.totalorder %s867_s15, %s861_s9 }
 0x159   : > { %s536_s6 = sadd.f32 %s731_s28, %s525_s0 }
 0x15a   : > { %p870_p5 = por %p869_p3, %p868_p0 }
 0x15b   : > { %s547_s21 = sadd.f32 %s733_s29, %s536_s6 }
 0x15c   : > { %p871_p11 = pnand %p870_p5, %p864_p12 }
 0x15d   : > { %s558_s30 = sadd.f32 %s735_s5, %s547_s21 }
 0x15f   : > { %s561_s25 = smul.f32 0.0625, %s558_s30 }
 0x162   : > { %v817_v4 = vpop.eup %816 }
 0x163   : > { %740 = vpush %v817_v4 }
 0x194   : > { %s741_s13 = spop %740 }
 0x195   : > { %s585_s17 = smul.f32 %s741_s13, %s737_s4 }
 0x197   : > { %s586_s3 = sadd.f32 %s585_s17, %s561_s25 }
 0x199   : > { %v587_v5 = vstv %s586_s3 }
 0x19a   : > { %588 = vst [vmem:[%s184_s7] sm:$0x1] %v587_v5 }
 0x19b   : > { %874 = shalt.err (!%p871_p11)
}
 0x19c   : > { %s875_s18 = scalar_lea.hbm %s1208_s14, 16  ;;  %s879_s24 = scalar_lea.hbm %s1302_s19, 32 }
 0x19d   : > { %p876_p13 = scmp.ne.s32.totalorder %s1208_s14, %s875_s18  ;;  %p880_p6 = scmp.lt.u32.totalorder %s1208_s14, %s1302_s19 }
 0x19e   : > { %p881_p9 = scmp.lt.u32.totalorder %s879_s24, %s875_s18  ;;  %p883_p4 = scmp.lt.u32.totalorder %s875_s18, %s1208_s14 }
 0x19f   : > { %p877_p7 = pnand %p876_p13, %p1303_p8 }
 0x1a0   : > { %p882_p1 = por %p881_p9, %p880_p6 }
 0x1a1   : > { %p878_p10 = pneg %p877_p7 }
 0x1a2   : > { %p884_p2 = por %p883_p4, %p882_p1 }
 0x1a4   : > { %p885_p12 = pnand %p884_p2, %p878_p10 }
 0x1a6   : > { %888 = shalt.err (!%p885_p12)
}
 0x1a7   : > { %748 = dma.vmem_to_hbm [thread:$0]  (%p1303_p8), %s1210_s26, 16, %s1208_s14, %s590_s2  }
 0x1a8 PF: > { %s1304_s28 = sld [smem:[#allocation14_spill]]  ;;  %s1305_s29 = sld [smem:[#allocation19_spill]] }
 0x1a9   : > { %s1306_s5 = sld [smem:[#allocation18_spill]] }
 0x1ae   : > { %s614_s4 = sand.u32 1, %s1304_s28   ;;  %p1307_p0 = scmp.ne.s32.totalorder %s1305_s29, 0 }
 0x1af   : > { %p1308_p3 = scmp.ge.s32.totalorder %s1306_s5, 2  ;;  %s615_s0 = scalar_lea.sflag [#allocation7], %s614_s4 }
 0x1b1   : > { %p759_p5 = pnand %p1308_p3, %p1307_p0 }
 0x1b3   : > { %922 = dma.done.wait (!%p759_p5), %s615_s0, 16  }
 0x1b4   : > { %924 = vsyncadd (!%p759_p5), %s615_s0, 4294967280  ;;  %s19_s14 = sadd.s32 1, %s1306_s5   ;;  %s1309_s9 = sld [smem:[#allocation15_spill]] }
 0x1b5   : > { %p16_p11 = scmp.ge.s32.totalorder %s19_s14, 4   ;;  %s1310_s10 = sld [smem:[#allocation16_spill]] }
 0x1b6   : > { %s1311_s11 = sld [smem:[#allocation22_spill]]  ;;  %s1312_s12 = sld [smem:[#allocation17_spill]] }
 0x1b7   : > { %s1313_s13 = sld [smem:[#allocation20_spill]]  ;;  %18 = sbr.rel (!%p16_p11) target bundleno = 11 (0xb), region = 101 }
 0x1be   :  { %619 = vsyncpa [#allocation6], 1 }
 0x1bf   :  { %621 = vsyncpa [#allocation6 + $0x1], 1 }
 0x1c0   :  { %622 = vsyncpa [#allocation7], 1 }
 0x1c1   :  { %624 = vsyncpa [#allocation7 + $0x1], 1 }
 0x1c2   :  { %625 = vsyncpa [#allocation8], 1 }
 0x1c3   :  { %627 = vsyncpa [#allocation8 + $0x1], 1 }

</bundles_post_ra>
